<compile_context>
chip_gen: v6e
topology: v6e:2x2x1
jax: 0.10.0
libtpu: 0.0.40
codegen_flags: <defaults>
</compile_context>

<pallas_src>
import functools

import jax
import jax.numpy as jnp
from jax import lax
from jax.experimental import pallas as pl
from jax.experimental.pallas import tpu as pltpu


def _round_up(x, m):
    return ((x + m - 1) // m) * m


def _gru_kernel(nchunk_ref, len_ref, gx_ref, whh_hbm, bhhn_ref, out_ref,
                whh_ref, h_ref, dma_sem, *, t_chunk, h_pad, unroll):
    # grid = (batch_tiles, time_chunks); axis 1 is the sequential recurrence axis.
    b = pl.program_id(0)
    tc = pl.program_id(1)

    @pl.when(tc == 0)
    def _():
        # Load the recurrent weight once per batch tile (1-2 tiles total with large b_tile).
        # The async DMA overlaps with the hidden-state zero-init.
        cp = pltpu.make_async_copy(whh_hbm, whh_ref, dma_sem)
        cp.start()
        h_ref[...] = jnp.zeros_like(h_ref)
        cp.wait()

    lens = len_ref[...]                 # (b_tile, 1) int32 sequence lengths
    bhh_n = bhhn_ref[...]               # (1, H_pad) recurrent bias for the n gate only
    tile_chunks = nchunk_ref[b]         # scalar: number of time chunks this tile actually needs

    @pl.when(tc < tile_chunks)
    def _():
        t_base = tc * t_chunk

        def step(s, h):
            # Precomputed x@W_ih^T + b_ih (+ b_hh_{r,z}) for step t_base+s.
            gx = gx_ref[s].astype(jnp.float32)                   # (b_tile, 3*H_pad)
            gh = jnp.dot(h.astype(whh_ref.dtype), whh_ref[...],
                         preferred_element_type=jnp.float32)     # fused r|z|n recurrent matmul
            r = jax.nn.sigmoid(gx[:, :h_pad] + gh[:, :h_pad])
            z = jax.nn.sigmoid(gx[:, h_pad:2 * h_pad] + gh[:, h_pad:2 * h_pad])
            n = jnp.tanh(gx[:, 2 * h_pad:] + r * (gh[:, 2 * h_pad:] + bhh_n))
            h_new = (1.0 - z) * n + z * h
            # Freeze rows whose sequence has ended: final h == hidden state after step
            # (length-1), i.e. exactly what the packed-sequence gather returns.
            return jnp.where(t_base + s < lens, h_new, h)

        h_ref[...] = lax.fori_loop(0, t_chunk, step, h_ref[...], unroll=unroll)

    @pl.when(tc == pl.num_programs(1) - 1)
    def _():
        # l2norm: rsqrt (EUP) + multiply; epsilon guards against zero-norm rows.
        h = h_ref[...]
        inv = lax.rsqrt(jnp.sum(h * h, axis=1, keepdims=True) + 1e-12)
        out_ref[...] = h * inv


def vsepp_text_encoder_pallas(input_ids, lengths, params, use_abs=False, *,
                              t_chunk=8, b_tile=None,
                              gx_dtype=jnp.float32, mxu_dtype=jnp.float32):
    """input_ids: (B, T) int32 ; lengths: (B,) int32 (each in [1, T]).

    Production configs (H=1024, large B): pass gx_dtype=jnp.bfloat16 (and optionally
    mxu_dtype=jnp.bfloat16) — required to fit v7x's 64 MiB VMEM with b_tile=256, t_chunk=8.
    """
    embed_tbl = params["embed"]               # (V, D)
    w_ih = params["w_ih"]                     # (3H, D), gate order r,z,n (PyTorch layout)
    w_hh = params["w_hh"]                     # (3H, H)
    b_ih = params["b_ih"]                     # (3H,)
    b_hh = params["b_hh"]                     # (3H,)

    B, T = input_ids.shape
    D = embed_tbl.shape[1]
    H = w_hh.shape[1]
    f32 = jnp.float32

    H_pad = _round_up(H, 128)                 # lane-dense hidden dim
    if b_tile is None:
        # Big batch tiles -> full MXU rows and at most a couple of W_hh copies;
        # cap at 256 so the VMEM budget stays bounded (and 2 tiles at B~512 -> 1 per v7x core).
        b_tile = min(256, _round_up(B, 8))
    b_tile = _round_up(b_tile, 8)
    B_pad = _round_up(B, b_tile)
    T_pad = _round_up(T, t_chunk)
    num_b_tiles = B_pad // b_tile
    num_t_chunks = T_pad // t_chunk

    # ---- Glue + hoisted input projection (one dense MXU GEMM, outside the recurrence). ----
    # Transpose the small embedding (B,T,D)->(T,B,D) BEFORE the big GEMM so gx is produced
    # directly in (T, B, 3*H_pad) layout with a single pad (no extra HBM passes on ~3H arrays).
    emb_t = jnp.transpose(embed_tbl[input_ids].astype(f32), (1, 0, 2))        # (T, B, D)
    w_in = jnp.transpose(w_ih.astype(f32).reshape(3, H, D), (2, 0, 1))        # (D, gate, out)
    w_in = jnp.pad(w_in, ((0, 0), (0, 0), (0, H_pad - H))).reshape(D, 3 * H_pad)
    # Fold b_ih (all gates) + b_hh for the r/z gates into the precomputed gates;
    # only b_hh_n must remain in-kernel (it sits inside the r* multiply).
    b_hh3 = b_hh.astype(f32).reshape(3, H)
    b_fold = b_ih.astype(f32).reshape(3, H) + jnp.concatenate(
        [b_hh3[:2], jnp.zeros((1, H), f32)], axis=0)
    b_fold = jnp.pad(b_fold, ((0, 0), (0, H_pad - H))).reshape(1, 1, 3 * H_pad)
    gx = jnp.einsum("tbd,dg->tbg", emb_t, w_in) + b_fold                      # (T, B, 3*H_pad)
    gx = jnp.pad(gx, ((0, T_pad - T), (0, B_pad - B), (0, 0))).astype(gx_dtype)

    # Fused, lane-padded recurrent weight: (H_pad, 3*H_pad) so gh = h @ whh.
    whh = jnp.transpose(w_hh.astype(f32).reshape(3, H, H), (0, 2, 1))         # (gate, in, out)
    whh = jnp.pad(whh, ((0, 0), (0, H_pad - H), (0, H_pad - H)))
    whh = jnp.transpose(whh, (1, 0, 2)).reshape(H_pad, 3 * H_pad).astype(mxu_dtype)

    bhh_n = jnp.pad(b_hh3[2], (0, H_pad - H)).reshape(1, H_pad).astype(f32)

    len_pad = jnp.pad(lengths.astype(jnp.int32), (0, B_pad - B), constant_values=1)
    # Per-batch-tile number of time chunks actually needed (scalar-prefetched to SMEM).
    tile_max = jnp.max(len_pad.reshape(num_b_tiles, b_tile), axis=1)
    tile_chunks = ((tile_max + t_chunk - 1) // t_chunk).astype(jnp.int32)     # (num_b_tiles,)
    len_col = len_pad.reshape(B_pad, 1)

    # VMEM budget: double-buffered gx block + single-buffered W_hh + h/out + margin.
    gx_blk_bytes = t_chunk * b_tile * 3 * H_pad * jnp.dtype(gx_dtype).itemsize
    whh_bytes = H_pad * 3 * H_pad * jnp.dtype(mxu_dtype).itemsize
    h_bytes = b_tile * H_pad * 4
    out_bytes = b_tile * H_pad * 4
    vmem_need = 2 * gx_blk_bytes + whh_bytes + h_bytes + 2 * out_bytes + (6 << 20)
    vmem_limit = int(min(max(vmem_need, 16 << 20), 112 << 20))

    unroll = True if b_tile <= 32 else 2
    grid = (num_b_tiles, num_t_chunks)
    kernel = functools.partial(_gru_kernel, t_chunk=t_chunk, h_pad=H_pad, unroll=unroll)

    out = pl.pallas_call(
        kernel,
        out_shape=jax.ShapeDtypeStruct((B_pad, H_pad), jnp.float32),
        grid_spec=pltpu.PrefetchScalarGridSpec(
            num_scalar_prefetch=1,            # tile_chunks -> SMEM, visible to index_maps
            grid=grid,
            in_specs=[
                pl.BlockSpec((b_tile, 1), lambda b, tc, nck: (b, 0)),         # lengths
                # gx stream; clamp the chunk index so finished tiles issue no new DMAs.
                pl.BlockSpec((t_chunk, b_tile, 3 * H_pad),
                             lambda b, tc, nck: (jnp.minimum(tc, nck[b] - 1), b, 0)),
                pl.BlockSpec(memory_space=pl.ANY),                            # W_hh (HBM)
                pl.BlockSpec((1, H_pad), lambda b, tc, nck: (0, 0)),          # b_hh_n
            ],
            out_specs=pl.BlockSpec((b_tile, H_pad), lambda b, tc, nck: (b, 0)),
            scratch_shapes=[
                pltpu.VMEM((H_pad, 3 * H_pad), mxu_dtype),   # single-buffered W_hh
                pltpu.VMEM((b_tile, H_pad), jnp.float32),    # recurrent hidden state (f32)
                pltpu.SemaphoreType.DMA(()),                 # W_hh copy completion
            ],
        ),
        compiler_params=pltpu.CompilerParams(
            dimension_semantics=("parallel", "arbitrary"),   # batch tiles parallel, time sequential
            vmem_limit_bytes=vmem_limit,
        ),
    )(tile_chunks, len_col, gx, whh, bhh_n)

    out = out[:B, :H]
    if use_abs:
        out = jnp.abs(out)
    return out


def vsepp_text_encoder_ref(input_ids, lengths, params, use_abs=False):
    """Pure-JAX reference with identical semantics (for correctness check)."""
    embed_tbl = params["embed"]
    w_ih, w_hh = params["w_ih"], params["w_hh"]
    b_ih, b_hh = params["b_ih"], params["b_hh"]
    B, T = input_ids.shape
    H = w_hh.shape[1]

    emb = embed_tbl[input_ids].astype(jnp.float32)     # (B, T, D)
    x_tm = jnp.transpose(emb, (1, 0, 2))               # (T, B, D)

    def step(h, x_t):
        gx = x_t @ w_ih.T + b_ih                       # (B, 3H)
        gh = h @ w_hh.T + b_hh
        r = jax.nn.sigmoid(gx[:, :H] + gh[:, :H])
        z = jax.nn.sigmoid(gx[:, H:2 * H] + gh[:, H:2 * H])
        n = jnp.tanh(gx[:, 2 * H:] + r * gh[:, 2 * H:])
        h_new = (1.0 - z) * n + z * h
        return h_new, h_new

    h0 = jnp.zeros((B, H), jnp.float32)
    _, hs = lax.scan(step, h0, x_tm)                   # (T, B, H)
    out = hs[lengths - 1, jnp.arange(B)]               # (B, H)
    out = out / jnp.sqrt(jnp.sum(out * out, axis=1, keepdims=True))
    if use_abs:
        out = jnp.abs(out)
    return out


def init_params(key, vocab_size, word_dim, embed_size):
    k0, k1, k2, k3, k4 = jax.random.split(key, 5)
    H = embed_size
    bound = 1.0 / jnp.sqrt(H)
    return {
        # nn.Embedding weight, uniform(-0.1, 0.1) per init_weights()
        "embed": jax.random.uniform(k0, (vocab_size, word_dim), jnp.float32, -0.1, 0.1),
        # nn.GRU params (PyTorch default uniform(-1/sqrt(H), 1/sqrt(H))), gate order r,z,n
        "w_ih": jax.random.uniform(k1, (3 * H, word_dim), jnp.float32, -bound, bound),
        "w_hh": jax.random.uniform(k2, (3 * H, H), jnp.float32, -bound, bound),
        "b_ih": jax.random.uniform(k3, (3 * H,), jnp.float32, -bound, bound),
        "b_hh": jax.random.uniform(k4, (3 * H,), jnp.float32, -bound, bound),
    }


if __name__ == "__main__":
    # Small synthetic config: vocab=50, word_dim=32, embed_size=32, num_layers=1
    VOCAB, WORD_DIM, EMBED_SIZE = 50, 32, 32
    B, T = 2, 8

    key = jax.random.PRNGKey(0)
    kp, ki = jax.random.split(key)
    params = init_params(kp, VOCAB, WORD_DIM, EMBED_SIZE)

    input_ids = jax.random.randint(ki, (B, T), 0, VOCAB, dtype=jnp.int32)
    # pack_padded_sequence (enforce_sorted=True) => lengths sorted descending
    lengths = jnp.array([T, 5], dtype=jnp.int32)

    ref = vsepp_text_encoder_ref(input_ids, lengths, params, use_abs=False)

    # f32 path (default) — strict check against the f32 reference.
    encode = jax.jit(lambda ids, lens, p: vsepp_text_encoder_pallas(ids, lens, p, use_abs=False))
    out = jax.block_until_ready(encode(input_ids, lengths, params))
    assert out.shape == (B, EMBED_SIZE)
    assert jnp.allclose(out, ref, atol=1e-4, rtol=1e-4), "mismatch vs JAX reference (f32 path)"
    assert jnp.allclose(jnp.sum(out * out, axis=1), 1.0, atol=1e-4)

    # bf16 gx stream + bf16 MXU operands (production perf config) — coarse sanity check.
    encode_bf16 = jax.jit(lambda ids, lens, p: vsepp_text_encoder_pallas(
        ids, lens, p, use_abs=False, gx_dtype=jnp.bfloat16, mxu_dtype=jnp.bfloat16))
    out_bf16 = jax.block_until_ready(encode_bf16(input_ids, lengths, params))
    assert out_bf16.shape == (B, EMBED_SIZE)
    assert jnp.allclose(out_bf16, ref, atol=5e-2, rtol=5e-2), "mismatch vs reference (bf16 path)"

    print("KERNEL_OK")
</pallas_src>

<mosaic_0001>
module attributes {stable_mosaic.version = 11 : i64} {
  func.func @_gru_kernel(%arg0: i32, %arg1: i32, %arg2: memref<1xi32, #tpu.memory_space<smem>>, %arg3: memref<8x1xi32, #tpu.memory_space<vmem>>, %arg4: memref<8x8x384xf32, #tpu.memory_space<vmem>>, %arg5: memref<128x384xf32, #tpu.memory_space<any>>, %arg6: memref<1x128xf32, #tpu.memory_space<vmem>>, %arg7: memref<8x128xf32, #tpu.memory_space<vmem>>, %arg8: memref<128x384xf32, #tpu.memory_space<vmem>>, %arg9: memref<8x128xf32, #tpu.memory_space<vmem>>, %arg10: memref<!tpu.dma_semaphore, #tpu.memory_space<semaphore_mem>>) attributes {dimension_semantics = [#tpu.dimension_semantics<parallel>, #tpu.dimension_semantics<arbitrary>], iteration_bounds = array<i64: 1, 1>, scalar_prefetch = 1 : i64, scratch_operands = 3 : i64, tpu.core_type = #tpu.core_type<tc>, window_params = [{transform_indices = @transform_0, window_bounds = array<i64: 8, 1>}, {transform_indices = @transform_1, window_bounds = array<i64: 8, 8, 384>}, {}, {pipeline_mode = #tpu.pipeline_mode<synchronous>, transform_indices = @transform_3, window_bounds = array<i64: 1, 128>}, {transform_indices = @transform_4, window_bounds = array<i64: 8, 128>}]} {
    %c0_i32 = arith.constant 0 : i32
    %0 = arith.cmpi eq, %arg1, %c0_i32 : i32
    %1 = arith.extui %0 : i1 to i32
    %c0_i32_0 = arith.constant 0 : i32
    %2 = arith.cmpi ne, %1, %c0_i32_0 : i32
    scf.if %2 {
      tpu.enqueue_dma source(%arg5 : memref<128x384xf32, #tpu.memory_space<any>>) target(%arg8 : memref<128x384xf32, #tpu.memory_space<vmem>>) target_semaphore(%arg10 : memref<!tpu.dma_semaphore, #tpu.memory_space<semaphore_mem>>)
      %cst = arith.constant 0.000000e+00 : f32
      %13 = vector.broadcast %cst : f32 to vector<8x128xf32>
      %c0_7 = arith.constant 0 : index
      %c0_8 = arith.constant 0 : index
      %14 = vector.load %arg9[%c0_7, %c0_8] : memref<8x128xf32, #tpu.memory_space<vmem>>, vector<8x128xf32>
      tpu.vector_store %arg9[%c0_7, %c0_8], %13 {strides = array<i32>} : memref<8x128xf32, #tpu.memory_space<vmem>>, vector<8x128xf32>,
      tpu.wait_dma2 semaphore(%arg10 : memref<!tpu.dma_semaphore, #tpu.memory_space<semaphore_mem>>) src(%arg5 : memref<128x384xf32, #tpu.memory_space<any>>) dst(%arg8 : memref<128x384xf32, #tpu.memory_space<vmem>>)
    } else {
    }
    %c0 = arith.constant 0 : index
    %c0_1 = arith.constant 0 : index
    %3 = vector.load %arg3[%c0, %c0_1] : memref<8x1xi32, #tpu.memory_space<vmem>>, vector<8x1xi32>
    %c0_2 = arith.constant 0 : index
    %c0_3 = arith.constant 0 : index
    %4 = vector.load %arg6[%c0_2, %c0_3] : memref<1x128xf32, #tpu.memory_space<vmem>>, vector<1x128xf32>
    %5 = arith.index_cast %arg0 : i32 to index
    %6 = memref.load %arg2[%5] : memref<1xi32, #tpu.memory_space<smem>>
    %7 = arith.cmpi slt, %arg1, %6 : i32
    %8 = arith.extui %7 : i1 to i32
    %c0_i32_4 = arith.constant 0 : i32
    %9 = arith.cmpi ne, %8, %c0_i32_4 : i32
    scf.if %9 {
      %c8_i32 = arith.constant 8 : i32
      %13 = arith.muli %arg1, %c8_i32 : i32
      %c0_7 = arith.constant 0 : index
      %c0_8 = arith.constant 0 : index
      %14 = vector.load %arg9[%c0_7, %c0_8] : memref<8x128xf32, #tpu.memory_space<vmem>>, vector<8x128xf32>
      %c0_i32_9 = arith.constant 0 : i32
      %15 = arith.index_cast %c0_i32_9 : i32 to index
      %c0_10 = arith.constant 0 : index
      %c0_11 = arith.constant 0 : index
      %16 = vector.load %arg4[%15, %c0_10, %c0_11] : memref<8x8x384xf32, #tpu.memory_space<vmem>>, vector<1x8x384xf32>
      %17 = vector.shape_cast %16 : vector<1x8x384xf32> to vector<8x384xf32>
      %c0_12 = arith.constant 0 : index
      %c0_13 = arith.constant 0 : index
      %18 = vector.load %arg8[%c0_12, %c0_13] : memref<128x384xf32, #tpu.memory_space<vmem>>, vector<128x384xf32>
      %cst = arith.constant dense<0.000000e+00> : vector<8x384xf32>
      %19 = tpu.matmul %14, %18, %cst {dimension_numbers = #tpu.dot_dimension_numbers<[1], [0], [0], [1], [0, 0, 1, 1], [], []>} : vector<8x128xf32>, vector<128x384xf32>, vector<8x384xf32> -> vector<8x384xf32>
      %20 = vector.extract_strided_slice %17 {offsets = [0, 0], sizes = [8, 128], strides = [1, 1]} : vector<8x384xf32> to vector<8x128xf32>
      %21 = vector.extract_strided_slice %19 {offsets = [0, 0], sizes = [8, 128], strides = [1, 1]} : vector<8x384xf32> to vector<8x128xf32>
      %22 = arith.addf %20, %21 : vector<8x128xf32>
      %23 = arith.negf %22 : vector<8x128xf32>
      %24 = math.exp %23 : vector<8x128xf32>
      %cst_14 = arith.constant 1.000000e+00 : f32
      %25 = vector.broadcast %cst_14 : f32 to vector<8x128xf32>
      %26 = arith.addf %25, %24 : vector<8x128xf32>
      %27 = arith.divf %25, %26 : vector<8x128xf32>
      %28 = vector.extract_strided_slice %17 {offsets = [0, 128], sizes = [8, 128], strides = [1, 1]} : vector<8x384xf32> to vector<8x128xf32>
      %29 = vector.extract_strided_slice %19 {offsets = [0, 128], sizes = [8, 128], strides = [1, 1]} : vector<8x384xf32> to vector<8x128xf32>
      %30 = arith.addf %28, %29 : vector<8x128xf32>
      %31 = arith.negf %30 : vector<8x128xf32>
      %32 = math.exp %31 : vector<8x128xf32>
      %cst_15 = arith.constant 1.000000e+00 : f32
      %33 = vector.broadcast %cst_15 : f32 to vector<8x128xf32>
      %34 = arith.addf %33, %32 : vector<8x128xf32>
      %35 = arith.divf %33, %34 : vector<8x128xf32>
      %36 = vector.extract_strided_slice %17 {offsets = [0, 256], sizes = [8, 128], strides = [1, 1]} : vector<8x384xf32> to vector<8x128xf32>
      %37 = vector.extract_strided_slice %19 {offsets = [0, 256], sizes = [8, 128], strides = [1, 1]} : vector<8x384xf32> to vector<8x128xf32>
      %38 = vector.broadcast %4 : vector<1x128xf32> to vector<8x128xf32>
      %39 = arith.addf %37, %38 : vector<8x128xf32>
      %40 = arith.mulf %27, %39 : vector<8x128xf32>
      %41 = arith.addf %36, %40 : vector<8x128xf32>
      %42 = math.tanh %41 : vector<8x128xf32>
      %cst_16 = arith.constant 1.000000e+00 : f32
      %43 = vector.broadcast %cst_16 : f32 to vector<8x128xf32>
      %44 = arith.subf %43, %35 : vector<8x128xf32>
      %45 = arith.mulf %44, %42 : vector<8x128xf32>
      %46 = arith.mulf %35, %14 : vector<8x128xf32>
      %47 = arith.addf %45, %46 : vector<8x128xf32>
      %48 = arith.addi %13, %c0_i32_9 : i32
      %49 = vector.broadcast %48 : i32 to vector<8x1xi32>
      %50 = arith.cmpi slt, %49, %3 : vector<8x1xi32>
      %51 = vector.shape_cast %50 : vector<8x1xi1> to vector<8x1xi1>
      %52 = vector.broadcast %51 : vector<8x1xi1> to vector<8x128xi1>
      %53 = arith.select %52, %47, %14 : vector<8x128xi1>, vector<8x128xf32>
      %c1_i32 = arith.constant 1 : i32
      %54 = arith.index_cast %c1_i32 : i32 to index
      %c0_17 = arith.constant 0 : index
      %c0_18 = arith.constant 0 : index
      %55 = vector.load %arg4[%54, %c0_17, %c0_18] : memref<8x8x384xf32, #tpu.memory_space<vmem>>, vector<1x8x384xf32>
      %56 = vector.shape_cast %55 : vector<1x8x384xf32> to vector<8x384xf32>
      %c0_19 = arith.constant 0 : index
      %c0_20 = arith.constant 0 : index
      %57 = vector.load %arg8[%c0_19, %c0_20] : memref<128x384xf32, #tpu.memory_space<vmem>>, vector<128x384xf32>
      %cst_21 = arith.constant dense<0.000000e+00> : vector<8x384xf32>
      %58 = tpu.matmul %53, %57, %cst_21 {dimension_numbers = #tpu.dot_dimension_numbers<[1], [0], [0], [1], [0, 0, 1, 1], [], []>} : vector<8x128xf32>, vector<128x384xf32>, vector<8x384xf32> -> vector<8x384xf32>
      %59 = vector.extract_strided_slice %56 {offsets = [0, 0], sizes = [8, 128], strides = [1, 1]} : vector<8x384xf32> to vector<8x128xf32>
      %60 = vector.extract_strided_slice %58 {offsets = [0, 0], sizes = [8, 128], strides = [1, 1]} : vector<8x384xf32> to vector<8x128xf32>
      %61 = arith.addf %59, %60 : vector<8x128xf32>
      %62 = arith.negf %61 : vector<8x128xf32>
      %63 = math.exp %62 : vector<8x128xf32>
      %cst_22 = arith.constant 1.000000e+00 : f32
      %64 = vector.broadcast %cst_22 : f32 to vector<8x128xf32>
      %65 = arith.addf %64, %63 : vector<8x128xf32>
      %66 = arith.divf %64, %65 : vector<8x128xf32>
      %67 = vector.extract_strided_slice %56 {offsets = [0, 128], sizes = [8, 128], strides = [1, 1]} : vector<8x384xf32> to vector<8x128xf32>
      %68 = vector.extract_strided_slice %58 {offsets = [0, 128], sizes = [8, 128], strides = [1, 1]} : vector<8x384xf32> to vector<8x128xf32>
      %69 = arith.addf %67, %68 : vector<8x128xf32>
      %70 = arith.negf %69 : vector<8x128xf32>
      %71 = math.exp %70 : vector<8x128xf32>
      %cst_23 = arith.constant 1.000000e+00 : f32
      %72 = vector.broadcast %cst_23 : f32 to vector<8x128xf32>
      %73 = arith.addf %72, %71 : vector<8x128xf32>
      %74 = arith.divf %72, %73 : vector<8x128xf32>
      %75 = vector.extract_strided_slice %56 {offsets = [0, 256], sizes = [8, 128], strides = [1, 1]} : vector<8x384xf32> to vector<8x128xf32>
      %76 = vector.extract_strided_slice %58 {offsets = [0, 256], sizes = [8, 128], strides = [1, 1]} : vector<8x384xf32> to vector<8x128xf32>
      %77 = vector.broadcast %4 : vector<1x128xf32> to vector<8x128xf32>
      %78 = arith.addf %76, %77 : vector<8x128xf32>
      %79 = arith.mulf %66, %78 : vector<8x128xf32>
      %80 = arith.addf %75, %79 : vector<8x128xf32>
      %81 = math.tanh %80 : vector<8x128xf32>
      %cst_24 = arith.constant 1.000000e+00 : f32
      %82 = vector.broadcast %cst_24 : f32 to vector<8x128xf32>
      %83 = arith.subf %82, %74 : vector<8x128xf32>
      %84 = arith.mulf %83, %81 : vector<8x128xf32>
      %85 = arith.mulf %74, %53 : vector<8x128xf32>
      %86 = arith.addf %84, %85 : vector<8x128xf32>
      %87 = arith.addi %13, %c1_i32 : i32
      %88 = vector.broadcast %87 : i32 to vector<8x1xi32>
      %89 = arith.cmpi slt, %88, %3 : vector<8x1xi32>
      %90 = vector.shape_cast %89 : vector<8x1xi1> to vector<8x1xi1>
      %91 = vector.broadcast %90 : vector<8x1xi1> to vector<8x128xi1>
      %92 = arith.select %91, %86, %53 : vector<8x128xi1>, vector<8x128xf32>
      %c2_i32 = arith.constant 2 : i32
      %93 = arith.index_cast %c2_i32 : i32 to index
      %c0_25 = arith.constant 0 : index
      %c0_26 = arith.constant 0 : index
      %94 = vector.load %arg4[%93, %c0_25, %c0_26] : memref<8x8x384xf32, #tpu.memory_space<vmem>>, vector<1x8x384xf32>
      %95 = vector.shape_cast %94 : vector<1x8x384xf32> to vector<8x384xf32>
      %c0_27 = arith.constant 0 : index
      %c0_28 = arith.constant 0 : index
      %96 = vector.load %arg8[%c0_27, %c0_28] : memref<128x384xf32, #tpu.memory_space<vmem>>, vector<128x384xf32>
      %cst_29 = arith.constant dense<0.000000e+00> : vector<8x384xf32>
      %97 = tpu.matmul %92, %96, %cst_29 {dimension_numbers = #tpu.dot_dimension_numbers<[1], [0], [0], [1], [0, 0, 1, 1], [], []>} : vector<8x128xf32>, vector<128x384xf32>, vector<8x384xf32> -> vector<8x384xf32>
      %98 = vector.extract_strided_slice %95 {offsets = [0, 0], sizes = [8, 128], strides = [1, 1]} : vector<8x384xf32> to vector<8x128xf32>
      %99 = vector.extract_strided_slice %97 {offsets = [0, 0], sizes = [8, 128], strides = [1, 1]} : vector<8x384xf32> to vector<8x128xf32>
      %100 = arith.addf %98, %99 : vector<8x128xf32>
      %101 = arith.negf %100 : vector<8x128xf32>
      %102 = math.exp %101 : vector<8x128xf32>
      %cst_30 = arith.constant 1.000000e+00 : f32
      %103 = vector.broadcast %cst_30 : f32 to vector<8x128xf32>
      %104 = arith.addf %103, %102 : vector<8x128xf32>
      %105 = arith.divf %103, %104 : vector<8x128xf32>
      %106 = vector.extract_strided_slice %95 {offsets = [0, 128], sizes = [8, 128], strides = [1, 1]} : vector<8x384xf32> to vector<8x128xf32>
      %107 = vector.extract_strided_slice %97 {offsets = [0, 128], sizes = [8, 128], strides = [1, 1]} : vector<8x384xf32> to vector<8x128xf32>
      %108 = arith.addf %106, %107 : vector<8x128xf32>
      %109 = arith.negf %108 : vector<8x128xf32>
      %110 = math.exp %109 : vector<8x128xf32>
      %cst_31 = arith.constant 1.000000e+00 : f32
      %111 = vector.broadcast %cst_31 : f32 to vector<8x128xf32>
      %112 = arith.addf %111, %110 : vector<8x128xf32>
      %113 = arith.divf %111, %112 : vector<8x128xf32>
      %114 = vector.extract_strided_slice %95 {offsets = [0, 256], sizes = [8, 128], strides = [1, 1]} : vector<8x384xf32> to vector<8x128xf32>
      %115 = vector.extract_strided_slice %97 {offsets = [0, 256], sizes = [8, 128], strides = [1, 1]} : vector<8x384xf32> to vector<8x128xf32>
      %116 = vector.broadcast %4 : vector<1x128xf32> to vector<8x128xf32>
      %117 = arith.addf %115, %116 : vector<8x128xf32>
      %118 = arith.mulf %105, %117 : vector<8x128xf32>
      %119 = arith.addf %114, %118 : vector<8x128xf32>
      %120 = math.tanh %119 : vector<8x128xf32>
      %cst_32 = arith.constant 1.000000e+00 : f32
      %121 = vector.broadcast %cst_32 : f32 to vector<8x128xf32>
      %122 = arith.subf %121, %113 : vector<8x128xf32>
      %123 = arith.mulf %122, %120 : vector<8x128xf32>
      %124 = arith.mulf %113, %92 : vector<8x128xf32>
      %125 = arith.addf %123, %124 : vector<8x128xf32>
      %126 = arith.addi %13, %c2_i32 : i32
      %127 = vector.broadcast %126 : i32 to vector<8x1xi32>
      %128 = arith.cmpi slt, %127, %3 : vector<8x1xi32>
      %129 = vector.shape_cast %128 : vector<8x1xi1> to vector<8x1xi1>
      %130 = vector.broadcast %129 : vector<8x1xi1> to vector<8x128xi1>
      %131 = arith.select %130, %125, %92 : vector<8x128xi1>, vector<8x128xf32>
      %c3_i32 = arith.constant 3 : i32
      %132 = arith.index_cast %c3_i32 : i32 to index
      %c0_33 = arith.constant 0 : index
      %c0_34 = arith.constant 0 : index
      %133 = vector.load %arg4[%132, %c0_33, %c0_34] : memref<8x8x384xf32, #tpu.memory_space<vmem>>, vector<1x8x384xf32>
      %134 = vector.shape_cast %133 : vector<1x8x384xf32> to vector<8x384xf32>
      %c0_35 = arith.constant 0 : index
      %c0_36 = arith.constant 0 : index
      %135 = vector.load %arg8[%c0_35, %c0_36] : memref<128x384xf32, #tpu.memory_space<vmem>>, vector<128x384xf32>
      %cst_37 = arith.constant dense<0.000000e+00> : vector<8x384xf32>
      %136 = tpu.matmul %131, %135, %cst_37 {dimension_numbers = #tpu.dot_dimension_numbers<[1], [0], [0], [1], [0, 0, 1, 1], [], []>} : vector<8x128xf32>, vector<128x384xf32>, vector<8x384xf32> -> vector<8x384xf32>
      %137 = vector.extract_strided_slice %134 {offsets = [0, 0], sizes = [8, 128], strides = [1, 1]} : vector<8x384xf32> to vector<8x128xf32>
      %138 = vector.extract_strided_slice %136 {offsets = [0, 0], sizes = [8, 128], strides = [1, 1]} : vector<8x384xf32> to vector<8x128xf32>
      %139 = arith.addf %137, %138 : vector<8x128xf32>
      %140 = arith.negf %139 : vector<8x128xf32>
      %141 = math.exp %140 : vector<8x128xf32>
      %cst_38 = arith.constant 1.000000e+00 : f32
      %142 = vector.broadcast %cst_38 : f32 to vector<8x128xf32>
      %143 = arith.addf %142, %141 : vector<8x128xf32>
      %144 = arith.divf %142, %143 : vector<8x128xf32>
      %145 = vector.extract_strided_slice %134 {offsets = [0, 128], sizes = [8, 128], strides = [1, 1]} : vector<8x384xf32> to vector<8x128xf32>
      %146 = vector.extract_strided_slice %136 {offsets = [0, 128], sizes = [8, 128], strides = [1, 1]} : vector<8x384xf32> to vector<8x128xf32>
      %147 = arith.addf %145, %146 : vector<8x128xf32>
      %148 = arith.negf %147 : vector<8x128xf32>
      %149 = math.exp %148 : vector<8x128xf32>
      %cst_39 = arith.constant 1.000000e+00 : f32
      %150 = vector.broadcast %cst_39 : f32 to vector<8x128xf32>
      %151 = arith.addf %150, %149 : vector<8x128xf32>
      %152 = arith.divf %150, %151 : vector<8x128xf32>
      %153 = vector.extract_strided_slice %134 {offsets = [0, 256], sizes = [8, 128], strides = [1, 1]} : vector<8x384xf32> to vector<8x128xf32>
      %154 = vector.extract_strided_slice %136 {offsets = [0, 256], sizes = [8, 128], strides = [1, 1]} : vector<8x384xf32> to vector<8x128xf32>
      %155 = vector.broadcast %4 : vector<1x128xf32> to vector<8x128xf32>
      %156 = arith.addf %154, %155 : vector<8x128xf32>
      %157 = arith.mulf %144, %156 : vector<8x128xf32>
      %158 = arith.addf %153, %157 : vector<8x128xf32>
      %159 = math.tanh %158 : vector<8x128xf32>
      %cst_40 = arith.constant 1.000000e+00 : f32
      %160 = vector.broadcast %cst_40 : f32 to vector<8x128xf32>
      %161 = arith.subf %160, %152 : vector<8x128xf32>
      %162 = arith.mulf %161, %159 : vector<8x128xf32>
      %163 = arith.mulf %152, %131 : vector<8x128xf32>
      %164 = arith.addf %162, %163 : vector<8x128xf32>
      %165 = arith.addi %13, %c3_i32 : i32
      %166 = vector.broadcast %165 : i32 to vector<8x1xi32>
      %167 = arith.cmpi slt, %166, %3 : vector<8x1xi32>
      %168 = vector.shape_cast %167 : vector<8x1xi1> to vector<8x1xi1>
      %169 = vector.broadcast %168 : vector<8x1xi1> to vector<8x128xi1>
      %170 = arith.select %169, %164, %131 : vector<8x128xi1>, vector<8x128xf32>
      %c4_i32 = arith.constant 4 : i32
      %171 = arith.index_cast %c4_i32 : i32 to index
      %c0_41 = arith.constant 0 : index
      %c0_42 = arith.constant 0 : index
      %172 = vector.load %arg4[%171, %c0_41, %c0_42] : memref<8x8x384xf32, #tpu.memory_space<vmem>>, vector<1x8x384xf32>
      %173 = vector.shape_cast %172 : vector<1x8x384xf32> to vector<8x384xf32>
      %c0_43 = arith.constant 0 : index
      %c0_44 = arith.constant 0 : index
      %174 = vector.load %arg8[%c0_43, %c0_44] : memref<128x384xf32, #tpu.memory_space<vmem>>, vector<128x384xf32>
      %cst_45 = arith.constant dense<0.000000e+00> : vector<8x384xf32>
      %175 = tpu.matmul %170, %174, %cst_45 {dimension_numbers = #tpu.dot_dimension_numbers<[1], [0], [0], [1], [0, 0, 1, 1], [], []>} : vector<8x128xf32>, vector<128x384xf32>, vector<8x384xf32> -> vector<8x384xf32>
      %176 = vector.extract_strided_slice %173 {offsets = [0, 0], sizes = [8, 128], strides = [1, 1]} : vector<8x384xf32> to vector<8x128xf32>
      %177 = vector.extract_strided_slice %175 {offsets = [0, 0], sizes = [8, 128], strides = [1, 1]} : vector<8x384xf32> to vector<8x128xf32>
      %178 = arith.addf %176, %177 : vector<8x128xf32>
      %179 = arith.negf %178 : vector<8x128xf32>
      %180 = math.exp %179 : vector<8x128xf32>
      %cst_46 = arith.constant 1.000000e+00 : f32
      %181 = vector.broadcast %cst_46 : f32 to vector<8x128xf32>
      %182 = arith.addf %181, %180 : vector<8x128xf32>
      %183 = arith.divf %181, %182 : vector<8x128xf32>
      %184 = vector.extract_strided_slice %173 {offsets = [0, 128], sizes = [8, 128], strides = [1, 1]} : vector<8x384xf32> to vector<8x128xf32>
      %185 = vector.extract_strided_slice %175 {offsets = [0, 128], sizes = [8, 128], strides = [1, 1]} : vector<8x384xf32> to vector<8x128xf32>
      %186 = arith.addf %184, %185 : vector<8x128xf32>
      %187 = arith.negf %186 : vector<8x128xf32>
      %188 = math.exp %187 : vector<8x128xf32>
      %cst_47 = arith.constant 1.000000e+00 : f32
      %189 = vector.broadcast %cst_47 : f32 to vector<8x128xf32>
      %190 = arith.addf %189, %188 : vector<8x128xf32>
      %191 = arith.divf %189, %190 : vector<8x128xf32>
      %192 = vector.extract_strided_slice %173 {offsets = [0, 256], sizes = [8, 128], strides = [1, 1]} : vector<8x384xf32> to vector<8x128xf32>
      %193 = vector.extract_strided_slice %175 {offsets = [0, 256], sizes = [8, 128], strides = [1, 1]} : vector<8x384xf32> to vector<8x128xf32>
      %194 = vector.broadcast %4 : vector<1x128xf32> to vector<8x128xf32>
      %195 = arith.addf %193, %194 : vector<8x128xf32>
      %196 = arith.mulf %183, %195 : vector<8x128xf32>
      %197 = arith.addf %192, %196 : vector<8x128xf32>
      %198 = math.tanh %197 : vector<8x128xf32>
      %cst_48 = arith.constant 1.000000e+00 : f32
      %199 = vector.broadcast %cst_48 : f32 to vector<8x128xf32>
      %200 = arith.subf %199, %191 : vector<8x128xf32>
      %201 = arith.mulf %200, %198 : vector<8x128xf32>
      %202 = arith.mulf %191, %170 : vector<8x128xf32>
      %203 = arith.addf %201, %202 : vector<8x128xf32>
      %204 = arith.addi %13, %c4_i32 : i32
      %205 = vector.broadcast %204 : i32 to vector<8x1xi32>
      %206 = arith.cmpi slt, %205, %3 : vector<8x1xi32>
      %207 = vector.shape_cast %206 : vector<8x1xi1> to vector<8x1xi1>
      %208 = vector.broadcast %207 : vector<8x1xi1> to vector<8x128xi1>
      %209 = arith.select %208, %203, %170 : vector<8x128xi1>, vector<8x128xf32>
      %c5_i32 = arith.constant 5 : i32
      %210 = arith.index_cast %c5_i32 : i32 to index
      %c0_49 = arith.constant 0 : index
      %c0_50 = arith.constant 0 : index
      %211 = vector.load %arg4[%210, %c0_49, %c0_50] : memref<8x8x384xf32, #tpu.memory_space<vmem>>, vector<1x8x384xf32>
      %212 = vector.shape_cast %211 : vector<1x8x384xf32> to vector<8x384xf32>
      %c0_51 = arith.constant 0 : index
      %c0_52 = arith.constant 0 : index
      %213 = vector.load %arg8[%c0_51, %c0_52] : memref<128x384xf32, #tpu.memory_space<vmem>>, vector<128x384xf32>
      %cst_53 = arith.constant dense<0.000000e+00> : vector<8x384xf32>
      %214 = tpu.matmul %209, %213, %cst_53 {dimension_numbers = #tpu.dot_dimension_numbers<[1], [0], [0], [1], [0, 0, 1, 1], [], []>} : vector<8x128xf32>, vector<128x384xf32>, vector<8x384xf32> -> vector<8x384xf32>
      %215 = vector.extract_strided_slice %212 {offsets = [0, 0], sizes = [8, 128], strides = [1, 1]} : vector<8x384xf32> to vector<8x128xf32>
      %216 = vector.extract_strided_slice %214 {offsets = [0, 0], sizes = [8, 128], strides = [1, 1]} : vector<8x384xf32> to vector<8x128xf32>
      %217 = arith.addf %215, %216 : vector<8x128xf32>
      %218 = arith.negf %217 : vector<8x128xf32>
      %219 = math.exp %218 : vector<8x128xf32>
      %cst_54 = arith.constant 1.000000e+00 : f32
      %220 = vector.broadcast %cst_54 : f32 to vector<8x128xf32>
      %221 = arith.addf %220, %219 : vector<8x128xf32>
      %222 = arith.divf %220, %221 : vector<8x128xf32>
      %223 = vector.extract_strided_slice %212 {offsets = [0, 128], sizes = [8, 128], strides = [1, 1]} : vector<8x384xf32> to vector<8x128xf32>
      %224 = vector.extract_strided_slice %214 {offsets = [0, 128], sizes = [8, 128], strides = [1, 1]} : vector<8x384xf32> to vector<8x128xf32>
      %225 = arith.addf %223, %224 : vector<8x128xf32>
      %226 = arith.negf %225 : vector<8x128xf32>
      %227 = math.exp %226 : vector<8x128xf32>
      %cst_55 = arith.constant 1.000000e+00 : f32
      %228 = vector.broadcast %cst_55 : f32 to vector<8x128xf32>
      %229 = arith.addf %228, %227 : vector<8x128xf32>
      %230 = arith.divf %228, %229 : vector<8x128xf32>
      %231 = vector.extract_strided_slice %212 {offsets = [0, 256], sizes = [8, 128], strides = [1, 1]} : vector<8x384xf32> to vector<8x128xf32>
      %232 = vector.extract_strided_slice %214 {offsets = [0, 256], sizes = [8, 128], strides = [1, 1]} : vector<8x384xf32> to vector<8x128xf32>
      %233 = vector.broadcast %4 : vector<1x128xf32> to vector<8x128xf32>
      %234 = arith.addf %232, %233 : vector<8x128xf32>
      %235 = arith.mulf %222, %234 : vector<8x128xf32>
      %236 = arith.addf %231, %235 : vector<8x128xf32>
      %237 = math.tanh %236 : vector<8x128xf32>
      %cst_56 = arith.constant 1.000000e+00 : f32
      %238 = vector.broadcast %cst_56 : f32 to vector<8x128xf32>
      %239 = arith.subf %238, %230 : vector<8x128xf32>
      %240 = arith.mulf %239, %237 : vector<8x128xf32>
      %241 = arith.mulf %230, %209 : vector<8x128xf32>
      %242 = arith.addf %240, %241 : vector<8x128xf32>
      %243 = arith.addi %13, %c5_i32 : i32
      %244 = vector.broadcast %243 : i32 to vector<8x1xi32>
      %245 = arith.cmpi slt, %244, %3 : vector<8x1xi32>
      %246 = vector.shape_cast %245 : vector<8x1xi1> to vector<8x1xi1>
      %247 = vector.broadcast %246 : vector<8x1xi1> to vector<8x128xi1>
      %248 = arith.select %247, %242, %209 : vector<8x128xi1>, vector<8x128xf32>
      %c6_i32 = arith.constant 6 : i32
      %249 = arith.index_cast %c6_i32 : i32 to index
      %c0_57 = arith.constant 0 : index
      %c0_58 = arith.constant 0 : index
      %250 = vector.load %arg4[%249, %c0_57, %c0_58] : memref<8x8x384xf32, #tpu.memory_space<vmem>>, vector<1x8x384xf32>
      %251 = vector.shape_cast %250 : vector<1x8x384xf32> to vector<8x384xf32>
      %c0_59 = arith.constant 0 : index
      %c0_60 = arith.constant 0 : index
      %252 = vector.load %arg8[%c0_59, %c0_60] : memref<128x384xf32, #tpu.memory_space<vmem>>, vector<128x384xf32>
      %cst_61 = arith.constant dense<0.000000e+00> : vector<8x384xf32>
      %253 = tpu.matmul %248, %252, %cst_61 {dimension_numbers = #tpu.dot_dimension_numbers<[1], [0], [0], [1], [0, 0, 1, 1], [], []>} : vector<8x128xf32>, vector<128x384xf32>, vector<8x384xf32> -> vector<8x384xf32>
      %254 = vector.extract_strided_slice %251 {offsets = [0, 0], sizes = [8, 128], strides = [1, 1]} : vector<8x384xf32> to vector<8x128xf32>
      %255 = vector.extract_strided_slice %253 {offsets = [0, 0], sizes = [8, 128], strides = [1, 1]} : vector<8x384xf32> to vector<8x128xf32>
      %256 = arith.addf %254, %255 : vector<8x128xf32>
      %257 = arith.negf %256 : vector<8x128xf32>
      %258 = math.exp %257 : vector<8x128xf32>
      %cst_62 = arith.constant 1.000000e+00 : f32
      %259 = vector.broadcast %cst_62 : f32 to vector<8x128xf32>
      %260 = arith.addf %259, %258 : vector<8x128xf32>
      %261 = arith.divf %259, %260 : vector<8x128xf32>
      %262 = vector.extract_strided_slice %251 {offsets = [0, 128], sizes = [8, 128], strides = [1, 1]} : vector<8x384xf32> to vector<8x128xf32>
      %263 = vector.extract_strided_slice %253 {offsets = [0, 128], sizes = [8, 128], strides = [1, 1]} : vector<8x384xf32> to vector<8x128xf32>
      %264 = arith.addf %262, %263 : vector<8x128xf32>
      %265 = arith.negf %264 : vector<8x128xf32>
      %266 = math.exp %265 : vector<8x128xf32>
      %cst_63 = arith.constant 1.000000e+00 : f32
      %267 = vector.broadcast %cst_63 : f32 to vector<8x128xf32>
      %268 = arith.addf %267, %266 : vector<8x128xf32>
      %269 = arith.divf %267, %268 : vector<8x128xf32>
      %270 = vector.extract_strided_slice %251 {offsets = [0, 256], sizes = [8, 128], strides = [1, 1]} : vector<8x384xf32> to vector<8x128xf32>
      %271 = vector.extract_strided_slice %253 {offsets = [0, 256], sizes = [8, 128], strides = [1, 1]} : vector<8x384xf32> to vector<8x128xf32>
      %272 = vector.broadcast %4 : vector<1x128xf32> to vector<8x128xf32>
      %273 = arith.addf %271, %272 : vector<8x128xf32>
      %274 = arith.mulf %261, %273 : vector<8x128xf32>
      %275 = arith.addf %270, %274 : vector<8x128xf32>
      %276 = math.tanh %275 : vector<8x128xf32>
      %cst_64 = arith.constant 1.000000e+00 : f32
      %277 = vector.broadcast %cst_64 : f32 to vector<8x128xf32>
      %278 = arith.subf %277, %269 : vector<8x128xf32>
      %279 = arith.mulf %278, %276 : vector<8x128xf32>
      %280 = arith.mulf %269, %248 : vector<8x128xf32>
      %281 = arith.addf %279, %280 : vector<8x128xf32>
      %282 = arith.addi %13, %c6_i32 : i32
      %283 = vector.broadcast %282 : i32 to vector<8x1xi32>
      %284 = arith.cmpi slt, %283, %3 : vector<8x1xi32>
      %285 = vector.shape_cast %284 : vector<8x1xi1> to vector<8x1xi1>
      %286 = vector.broadcast %285 : vector<8x1xi1> to vector<8x128xi1>
      %287 = arith.select %286, %281, %248 : vector<8x128xi1>, vector<8x128xf32>
      %c7_i32 = arith.constant 7 : i32
      %288 = arith.index_cast %c7_i32 : i32 to index
      %c0_65 = arith.constant 0 : index
      %c0_66 = arith.constant 0 : index
      %289 = vector.load %arg4[%288, %c0_65, %c0_66] : memref<8x8x384xf32, #tpu.memory_space<vmem>>, vector<1x8x384xf32>
      %290 = vector.shape_cast %289 : vector<1x8x384xf32> to vector<8x384xf32>
      %c0_67 = arith.constant 0 : index
      %c0_68 = arith.constant 0 : index
      %291 = vector.load %arg8[%c0_67, %c0_68] : memref<128x384xf32, #tpu.memory_space<vmem>>, vector<128x384xf32>
      %cst_69 = arith.constant dense<0.000000e+00> : vector<8x384xf32>
      %292 = tpu.matmul %287, %291, %cst_69 {dimension_numbers = #tpu.dot_dimension_numbers<[1], [0], [0], [1], [0, 0, 1, 1], [], []>} : vector<8x128xf32>, vector<128x384xf32>, vector<8x384xf32> -> vector<8x384xf32>
      %293 = vector.extract_strided_slice %290 {offsets = [0, 0], sizes = [8, 128], strides = [1, 1]} : vector<8x384xf32> to vector<8x128xf32>
      %294 = vector.extract_strided_slice %292 {offsets = [0, 0], sizes = [8, 128], strides = [1, 1]} : vector<8x384xf32> to vector<8x128xf32>
      %295 = arith.addf %293, %294 : vector<8x128xf32>
      %296 = arith.negf %295 : vector<8x128xf32>
      %297 = math.exp %296 : vector<8x128xf32>
      %cst_70 = arith.constant 1.000000e+00 : f32
      %298 = vector.broadcast %cst_70 : f32 to vector<8x128xf32>
      %299 = arith.addf %298, %297 : vector<8x128xf32>
      %300 = arith.divf %298, %299 : vector<8x128xf32>
      %301 = vector.extract_strided_slice %290 {offsets = [0, 128], sizes = [8, 128], strides = [1, 1]} : vector<8x384xf32> to vector<8x128xf32>
      %302 = vector.extract_strided_slice %292 {offsets = [0, 128], sizes = [8, 128], strides = [1, 1]} : vector<8x384xf32> to vector<8x128xf32>
      %303 = arith.addf %301, %302 : vector<8x128xf32>
      %304 = arith.negf %303 : vector<8x128xf32>
      %305 = math.exp %304 : vector<8x128xf32>
      %cst_71 = arith.constant 1.000000e+00 : f32
      %306 = vector.broadcast %cst_71 : f32 to vector<8x128xf32>
      %307 = arith.addf %306, %305 : vector<8x128xf32>
      %308 = arith.divf %306, %307 : vector<8x128xf32>
      %309 = vector.extract_strided_slice %290 {offsets = [0, 256], sizes = [8, 128], strides = [1, 1]} : vector<8x384xf32> to vector<8x128xf32>
      %310 = vector.extract_strided_slice %292 {offsets = [0, 256], sizes = [8, 128], strides = [1, 1]} : vector<8x384xf32> to vector<8x128xf32>
      %311 = vector.broadcast %4 : vector<1x128xf32> to vector<8x128xf32>
      %312 = arith.addf %310, %311 : vector<8x128xf32>
      %313 = arith.mulf %300, %312 : vector<8x128xf32>
      %314 = arith.addf %309, %313 : vector<8x128xf32>
      %315 = math.tanh %314 : vector<8x128xf32>
      %cst_72 = arith.constant 1.000000e+00 : f32
      %316 = vector.broadcast %cst_72 : f32 to vector<8x128xf32>
      %317 = arith.subf %316, %308 : vector<8x128xf32>
      %318 = arith.mulf %317, %315 : vector<8x128xf32>
      %319 = arith.mulf %308, %287 : vector<8x128xf32>
      %320 = arith.addf %318, %319 : vector<8x128xf32>
      %321 = arith.addi %13, %c7_i32 : i32
      %322 = vector.broadcast %321 : i32 to vector<8x1xi32>
      %323 = arith.cmpi slt, %322, %3 : vector<8x1xi32>
      %324 = vector.shape_cast %323 : vector<8x1xi1> to vector<8x1xi1>
      %325 = vector.broadcast %324 : vector<8x1xi1> to vector<8x128xi1>
      %326 = arith.select %325, %320, %287 : vector<8x128xi1>, vector<8x128xf32>
      %c8_i32_73 = arith.constant 8 : i32
      %c0_74 = arith.constant 0 : index
      %c0_75 = arith.constant 0 : index
      %327 = vector.load %arg9[%c0_74, %c0_75] : memref<8x128xf32, #tpu.memory_space<vmem>>, vector<8x128xf32>
      tpu.vector_store %arg9[%c0_74, %c0_75], %326 {strides = array<i32>} : memref<8x128xf32, #tpu.memory_space<vmem>>, vector<8x128xf32>,
    } else {
    }
    %c0_i32_5 = arith.constant 0 : i32
    %10 = arith.cmpi eq, %arg1, %c0_i32_5 : i32
    %11 = arith.extui %10 : i1 to i32
    %c0_i32_6 = arith.constant 0 : i32
    %12 = arith.cmpi ne, %11, %c0_i32_6 : i32
    scf.if %12 {
      %c0_7 = arith.constant 0 : index
      %c0_8 = arith.constant 0 : index
      %13 = vector.load %arg9[%c0_7, %c0_8] : memref<8x128xf32, #tpu.memory_space<vmem>>, vector<8x128xf32>
      %14 = arith.mulf %13, %13 : vector<8x128xf32>
      %cst = arith.constant dense<0.000000e+00> : vector<8xf32>
      %15 = vector.multi_reduction <add>, %14, %cst [1] : vector<8x128xf32> to vector<8xf32>
      %16 = vector.shape_cast %15 : vector<8xf32> to vector<8x1xf32>
      %cst_9 = arith.constant 9.99999996E-13 : f32
      %17 = vector.broadcast %cst_9 : f32 to vector<8x1xf32>
      %18 = arith.addf %16, %17 : vector<8x1xf32>
      %19 = math.rsqrt %18 : vector<8x1xf32>
      %20 = vector.broadcast %19 : vector<8x1xf32> to vector<8x128xf32>
      %21 = arith.mulf %13, %20 : vector<8x128xf32>
      %c0_10 = arith.constant 0 : index
      %c0_11 = arith.constant 0 : index
      %22 = vector.load %arg7[%c0_10, %c0_11] : memref<8x128xf32, #tpu.memory_space<vmem>>, vector<8x128xf32>
      tpu.vector_store %arg7[%c0_10, %c0_11], %21 {strides = array<i32>} : memref<8x128xf32, #tpu.memory_space<vmem>>, vector<8x128xf32>,
    } else {
    }
    return
  }
  func.func @transform_0(%arg0: i32, %arg1: i32, %arg2: memref<1xi32, #tpu.memory_space<smem>>) -> (i32, i32) {
    %c0_i32 = arith.constant 0 : i32
    %c0_i32_0 = arith.constant 0 : i32
    return %arg0, %c0_i32 : i32, i32
  }
  func.func @transform_1(%arg0: i32, %arg1: i32, %arg2: memref<1xi32, #tpu.memory_space<smem>>) -> (i32, i32, i32) {
    %0 = arith.index_cast %arg0 : i32 to index
    %1 = memref.load %arg2[%0] : memref<1xi32, #tpu.memory_space<smem>>
    %c1_i32 = arith.constant 1 : i32
    %2 = arith.subi %1, %c1_i32 : i32
    %3 = arith.minsi %arg1, %2 : i32
    %c0_i32 = arith.constant 0 : i32
    %c0_i32_0 = arith.constant 0 : i32
    return %3, %arg0, %c0_i32 : i32, i32, i32
  }
  func.func @transform_3(%arg0: i32, %arg1: i32, %arg2: memref<1xi32, #tpu.memory_space<smem>>) -> (i32, i32) {
    %c0_i32 = arith.constant 0 : i32
    %c0_i32_0 = arith.constant 0 : i32
    %c0_i32_1 = arith.constant 0 : i32
    return %c0_i32, %c0_i32_0 : i32, i32
  }
  func.func @transform_4(%arg0: i32, %arg1: i32, %arg2: memref<1xi32, #tpu.memory_space<smem>>) -> (i32, i32) {
    %c0_i32 = arith.constant 0 : i32
    %c0_i32_0 = arith.constant 0 : i32
    return %arg0, %c0_i32 : i32, i32
  }
}

</mosaic_0001>

<bundles_post_ra>
// kernel: _lambda_.1
= control target key start
LH: loop header
LB: loop body
LE: loop exit
PB: predicated region body
PF: predicated region fallthrough
CT: control target
= control target key end

     0   :  { %s3341_s0 = inlined_call_operand.<no memory space> [shape: s32[1], index: 0, kind: input, shape index: {}]   ;;  %s3342_s1 = inlined_call_operand.vmem [shape: s32[8,1], index: 1, kind: input, shape index: {}]   ;;  %s3343_s3 = inlined_call_operand.vmem [shape: f32[128,384], index: 3, kind: input, shape index: {}]   ;;  %s3344_s4 = inlined_call_operand.vmem [shape: f32[1,128], index: 4, kind: input, shape index: {}]   ;;  %s3345_s5 = inlined_call_operand.vmem [shape: f32[8,128], index: 5, kind: output, shape index: {}]   ;;  %s3346_s2 = inlined_call_operand.vmem [shape: f32[8,8,384], index: 2, kind: input, shape index: {}]  }
   0x1   :  { %s1708_s20 = sadd.s32 4294967295, %s3341_s0  ;;  %v94_v0 = vld [vmem:[%s3343_s3] sm:$0xff]  ;;  %v96_v1 = vld [vmem:[%s3343_s3 + $0x8] sm:$0xff]  ;;  %v98_v2 = vld [vmem:[%s3343_s3 + $0x10] sm:$0xff] }
   0x2   :  { %p1709_p0 = scmp.gt.s32.totalorder %s1708_s20, 0  ;;  %95 = vst [vmem:[#allocation2 + $0xb0] sm:$0xff] %v94_v0  ;;  %97 = vst [vmem:[#allocation2 + $0xd0] sm:$0xff] %v96_v1  ;;  %v100_v3 = vld [vmem:[%s3343_s3 + $0x18] sm:$0xff]  ;;  %v102_v4 = vld [vmem:[%s3343_s3 + $0x20] sm:$0xff] }
   0x3   :  { %99 = vst [vmem:[#allocation2 + $0x10] sm:$0xff] %v98_v2  ;;  %v104_v5 = vld [vmem:[%s3343_s3 + $0x28] sm:$0xff]  ;;  %101 = vst [vmem:[#allocation2 + $0x48] sm:$0xff] %v100_v3  ;;  %v106_v6 = vld [vmem:[%s3343_s3 + $0x30] sm:$0xff] }
   0x4   :  { %103 = vst [vmem:[#allocation2 + $0x160] sm:$0xff] %v102_v4  ;;  %105 = vst [vmem:[#allocation2 + $0x128] sm:$0xff] %v104_v5  ;;  %v108_v7 = vld [vmem:[%s3343_s3 + $0x38] sm:$0xff]  ;;  %v110_v8 = vld [vmem:[%s3343_s3 + $0x40] sm:$0xff]  ;;  %s3397_s20 = smov (%p1709_p0, %s1708_s20), 0 }
   0x5   :  { %107 = vst [vmem:[#allocation2 + $0x40] sm:$0xff] %v106_v6  ;;  %109 = vst [vmem:[#allocation2 + $0x178] sm:$0xff] %v108_v7  ;;  %v112_v9 = vld [vmem:[%s3343_s3 + $0x48] sm:$0xff]  ;;  %v114_v10 = vld [vmem:[%s3343_s3 + $0x50] sm:$0xff]  ;;  %s1710_s27 = sshll.u32 %s3397_s20, 3 }
   0x6   :  { %111 = vst [vmem:[#allocation2 + $0x108] sm:$0xff] %v110_v8  ;;  %v116_v11 = vld [vmem:[%s3343_s3 + $0x58] sm:$0xff]  ;;  %113 = vst [vmem:[#allocation2 + $0x110] sm:$0xff] %v112_v9  ;;  %v118_v12 = vld [vmem:[%s3343_s3 + $0x60] sm:$0xff]  ;;  %p47_p1 = scmp.lt.s32.totalorder %s1710_s27, 7 }
   0x7   :  { %115 = vst [vmem:[#allocation2 + $0x90] sm:$0xff] %v114_v10  ;;  %117 = vst [vmem:[#allocation2 + $0x118] sm:$0xff] %v116_v11  ;;  %v120_v13 = vld [vmem:[%s3343_s3 + $0x68] sm:$0xff]  ;;  %v122_v14 = vld [vmem:[%s3343_s3 + $0x70] sm:$0xff] }
   0x8   :  { %119 = vst [vmem:[#allocation2 + $0x148] sm:$0xff] %v118_v12  ;;  %121 = vst [vmem:[#allocation2 + $0x100] sm:$0xff] %v120_v13  ;;  %v124_v15 = vld [vmem:[%s3343_s3 + $0x78] sm:$0xff]  ;;  %v126_v16 = vld [vmem:[%s3343_s3 + $0x80] sm:$0xff]  ;;  %s3399_s27 = smov (!%p47_p1, %s1710_s27), 7 }
   0x9   :  { %123 = vst [vmem:[#allocation2 + $0x58] sm:$0xff] %v122_v14  ;;  %v128_v17 = vld [vmem:[%s3343_s3 + $0x88] sm:$0xff]  ;;  %125 = vst [vmem:[#allocation2 + $0xd8] sm:$0xff] %v124_v15  ;;  %v130_v18 = vld [vmem:[%s3343_s3 + $0x90] sm:$0xff]  ;;  %s2177_s20 = smul.u32 24, %s3399_s27 }
   0xa   :  { %127 = vst [vmem:[#allocation2 + $0x80] sm:$0xff] %v126_v16  ;;  %129 = vst [vmem:[#allocation2 + $0x130] sm:$0xff] %v128_v17  ;;  %v132_v19 = vld [vmem:[%s3343_s3 + $0x98] sm:$0xff]  ;;  %v134_v20 = vld [vmem:[%s3343_s3 + $0xa0] sm:$0xff] }
   0xb   :  { %131 = vst [vmem:[#allocation2 + $0x138] sm:$0xff] %v130_v18  ;;  %133 = vst [vmem:[#allocation2 + $0x120] sm:$0xff] %v132_v19  ;;  %v136_v21 = vld [vmem:[%s3343_s3 + $0xa8] sm:$0xff]  ;;  %v138_v22 = vld [vmem:[%s3343_s3 + $0xb0] sm:$0xff]  ;;  %s2467_s23 = scalar_lea.vmem %s3346_s2, %s2177_s20 }
   0xc   :  { %135 = vst [vmem:[#allocation2 + $0xe0] sm:$0xff] %v134_v20  ;;  %v140_v23 = vld [vmem:[%s3343_s3 + $0xb8] sm:$0xff]  ;;  %137 = vst [vmem:[#allocation2 + $0xa8] sm:$0xff] %v136_v21  ;;  %v142_v24 = vld [vmem:[%s3343_s3 + $0xc0] sm:$0xff] }
   0xd   :  { %139 = vst [vmem:[#allocation2 + $0xb8] sm:$0xff] %v138_v22  ;;  %141 = vst [vmem:[#allocation2 + $0x168] sm:$0xff] %v140_v23  ;;  %v144_v25 = vld [vmem:[%s3343_s3 + $0xc8] sm:$0xff]  ;;  %v146_v26 = vld [vmem:[%s3343_s3 + $0xd0] sm:$0xff] }
   0xe   :  { %143 = vst [vmem:[#allocation2 + $0xe8] sm:$0xff] %v142_v24  ;;  %145 = vst [vmem:[#allocation2 + $0xf8] sm:$0xff] %v144_v25  ;;  %v148_v27 = vld [vmem:[%s3343_s3 + $0xd8] sm:$0xff]  ;;  %v150_v28 = vld [vmem:[%s3343_s3 + $0xe0] sm:$0xff] }
   0xf   :  { %147 = vst [vmem:[#allocation2 + $0x20] sm:$0xff] %v146_v26  ;;  %v152_v29 = vld [vmem:[%s3343_s3 + $0xe8] sm:$0xff]  ;;  %149 = vst [vmem:[#allocation2 + $0x88] sm:$0xff] %v148_v27  ;;  %v154_v30 = vld [vmem:[%s3343_s3 + $0xf0] sm:$0xff] }
  0x10   :  { %151 = vst [vmem:[#allocation2 + $0xa0] sm:$0xff] %v150_v28  ;;  %153 = vst [vmem:[#allocation2 + $0x170] sm:$0xff] %v152_v29  ;;  %v156_v31 = vld [vmem:[%s3343_s3 + $0xf8] sm:$0xff]  ;;  %v158_v32 = vld [vmem:[%s3343_s3 + $0x100] sm:$0xff] }
  0x11   :  { %155 = vst [vmem:[#allocation2 + $0xf0] sm:$0xff] %v154_v30  ;;  %157 = vst [vmem:[#allocation2 + $0x140] sm:$0xff] %v156_v31  ;;  %v160_v33 = vld [vmem:[%s3343_s3 + $0x108] sm:$0xff]  ;;  %v162_v34 = vld [vmem:[%s3343_s3 + $0x110] sm:$0xff] }
  0x12   :  { %159 = vst [vmem:[#allocation2 + $0x60] sm:$0xff] %v158_v32  ;;  %v164_v35 = vld [vmem:[%s3343_s3 + $0x118] sm:$0xff]  ;;  %161 = vst [vmem:[#allocation2 + $0xc8] sm:$0xff] %v160_v33  ;;  %v166_v36 = vld [vmem:[%s3343_s3 + $0x120] sm:$0xff] }
  0x13   :  { %163 = vst [vmem:[#allocation2 + $0x28] sm:$0xff] %v162_v34  ;;  %165 = vst [vmem:[#allocation2 + $0x38] sm:$0xff] %v164_v35  ;;  %v168_v37 = vld [vmem:[%s3343_s3 + $0x128] sm:$0xff]  ;;  %v170_v38 = vld [vmem:[%s3343_s3 + $0x130] sm:$0xff] }
  0x14   :  { %167 = vst [vmem:[#allocation2 + $0xc0] sm:$0xff] %v166_v36  ;;  %169 = vst [vmem:[#allocation2 + $0x18] sm:$0xff] %v168_v37  ;;  %v172_v39 = vld [vmem:[%s3343_s3 + $0x138] sm:$0xff]  ;;  %v174_v40 = vld [vmem:[%s3343_s3 + $0x140] sm:$0xff] }
  0x15   :  { %171 = vst [vmem:[#allocation2 + $0x98] sm:$0xff] %v170_v38  ;;  %v176_v41 = vld [vmem:[%s3343_s3 + $0x148] sm:$0xff]  ;;  %173 = vst [vmem:[#allocation2 + $0x8] sm:$0xff] %v172_v39  ;;  %v178_v42 = vld [vmem:[%s3343_s3 + $0x150] sm:$0xff] }
  0x16   :  { %175 = vst [vmem:[#allocation2] sm:$0xff] %v174_v40  ;;  %177 = vst [vmem:[#allocation2 + $0x78] sm:$0xff] %v176_v41  ;;  %v180_v43 = vld [vmem:[%s3343_s3 + $0x158] sm:$0xff]  ;;  %v182_v44 = vld [vmem:[%s3343_s3 + $0x160] sm:$0xff] }
  0x17   :  { %179 = vst [vmem:[#allocation2 + $0x50] sm:$0xff] %v178_v42  ;;  %181 = vst [vmem:[#allocation2 + $0x68] sm:$0xff] %v180_v43  ;;  %v184_v45 = vld [vmem:[%s3343_s3 + $0x168] sm:$0xff]  ;;  %v186_v46 = vld [vmem:[%s3343_s3 + $0x170] sm:$0xff] }
  0x18   :  { %183 = vst [vmem:[#allocation2 + $0x70] sm:$0xff] %v182_v44  ;;  %v188_v47 = vld [vmem:[%s3343_s3 + $0x178] sm:$0xff]  ;;  %185 = vst [vmem:[#allocation2 + $0x30] sm:$0xff] %v184_v45 }
  0x19   :  { %187 = vst [vmem:[#allocation2 + $0x158] sm:$0xff] %v186_v46  ;;  %189 = vst [vmem:[#allocation2 + $0x150] sm:$0xff] %v188_v47 }
  0x1a   :  { %197 = vsyncadd [#allocation4], 6144  ;;  %v2316_v48 = vmov 0.0  }
  0x1b   :  { %198 = vst [vmem:[#allocation3] sm:$0xff] %v2316_v48 }
  0x1c   :  { %2314 = dma.done.wait [#allocation4], 6144 }
  0x1d   :  { %2315 = vsyncadd [#allocation4], 4294961152  ;;  %v2508_v49 = vld [vmem:[%s3342_s1] sm:$0xff]  ;;  %p1713_p2 = scmp.le.s32.totalorder %s3341_s0, 0 }
  0x1e   :  { %3367 = vst [vmem:[#allocation9_spill] sm:$0xff] %v2508_v49  ;;  %v2513_v50 = vld [vmem:[%s3344_s4] ss:$0 sm:$0xff] }
  0x1f   :  { %209 = sbr.rel (%p1713_p2) target bundleno = 2070 (0x816), region = 55 }
  0x24   :  { %v2518_v51 = vld [vmem:[#allocation2 + $0x158] sm:$0xff]  ;;  %v2520_v52 = vld [vmem:[#allocation2 + $0x30] sm:$0xff]  ;;  %v2522_v53 = vld [vmem:[#allocation2 + $0x68] sm:$0xff]  ;;  %v3353_v55 = vmov 0.0   ;;  %vm1717_vm0 = vcmp.gt.s32.totalorder %v2508_v49, 0  ;;  %v3347_v57 = vmov 0  }
  0x25   :  { %3368 = vst [vmem:[#allocation10_spill] sm:$0xff] %v2518_v51  ;;  %263 = vmatprep.subr.mxu0 %v2518_v51  ;;  %v2525_v54 = vld [vmem:[#allocation2 + $0x50] sm:$0xff]  ;;  %1897 = vmatprep.subr.mxu1 %v3353_v55  ;;  %v2530_v56 = vld [vmem:[#allocation2] sm:$0xff]  ;;  %v434_v58 = vsel %vm1717_vm0, 1, %v3347_v57  ;;  %v2535_v59 = vld [vmem:[#allocation2 + $0x8] sm:$0xff]  ;;  %vm2319_vm1 = vmmov 0  }
  0x26   :  { %264 = vmatpush1.msra.mxu0 %v2520_v52  ;;  %327 = vmatprep.mubr.f32.mxu0 %v3353_v55  ;;  %vm1723_vm2 = vcmp.gt.s32.totalorder %v2508_v49, 1  ;;  %v2541_v60 = vld [vmem:[#allocation2 + $0x18] sm:$0xff]  ;;  %v2545_v61 = vld [vmem:[#allocation2 + $0xc0] sm:$0xff]  ;;  %v2548_v62 = vld [vmem:[#allocation2 + $0x28] sm:$0xff]  ;;  %vm1741_vm3 = vcmp.gt.s32.totalorder %v2508_v49, 4  ;;  %vm1753_vm4 = vcmp.gt.s32.totalorder %v2508_v49, 6 }
  0x27   :  { %265 = vmatprep.subr.mxu0 %v2522_v53  ;;  %1929 = vmatprep.mubr.msk.f32.mxu1 %vm2319_vm1, %v3353_v55  ;;  %v610_v63 = vsel %vm1723_vm2, 1, %v3347_v57  ;;  %v2553_v0 = vld [vmem:[#allocation2 + $0xc8] sm:$0xff]  ;;  %v2556_v1 = vld [vmem:[#allocation2 + $0x140] sm:$0xff]  ;;  %v2559_v2 = vld [vmem:[#allocation2 + $0xf0] sm:$0xff]  ;;  %v1138_v36 = vsel %vm1741_vm3, 1, %v3347_v57  ;;  %v1490_v39 = vsel %vm1753_vm4, 1, %v3347_v57 }
  0x28   :  { %266 = vmatpush1.msra.mxu0 %v2525_v54  ;;  %2182 = vset.pattern.permute.xlu0 %v3347_v57  ;;  %v2562_v3 = vld [vmem:[#allocation2 + $0xa0] sm:$0xff]  ;;  %v2564_v4 = vld [vmem:[#allocation2 + $0x150] sm:$0xff]  ;;  %v2567_v5 = vld [vmem:[#allocation2 + $0x88] sm:$0xff] }
  0x29   :  { %267 = vmatprep.subr.mxu0 %v2530_v56  ;;  %436 = vperm.xlu0 %2182, %v434_v58   ;;  %v2570_v6 = vld [vmem:[#allocation2 + $0x70] sm:$0xff]  ;;  %v2573_v7 = vld [vmem:[#allocation2 + $0xf8] sm:$0xff]  ;;  %v2579_v9 = vld [vmem:[#allocation2 + $0xe8] sm:$0xff] }
  0x2a   :  { %268 = vmatpush1.msra.mxu0 %v2535_v59  ;;  %2183 = vset.pattern.permute.xlu1 %v3347_v57  ;;  %v2576_v8 = vld [vmem:[#allocation2 + $0x78] sm:$0xff]  ;;  %v2589_v12 = vld [vmem:[#allocation2 + $0xa8] sm:$0xff]  ;;  %v2593_v13 = vld [vmem:[#allocation2 + $0x120] sm:$0xff] }
  0x2b   :  { %269 = vmatprep.subr.mxu0 %v2541_v60  ;;  %1898 = vmatpush3.msra.mxu1 %v2564_v4  ;;  %v2583_v10 = vld [vmem:[#allocation2 + $0xb8] sm:$0xff]  ;;  %v2603_v16 = vld [vmem:[#allocation2 + $0x80] sm:$0xff]  ;;  %v2616_v20 = vld [vmem:[#allocation2 + $0x170] sm:$0xff] }
  0x2c   :  { %270 = vmatpush1.msra.mxu0 %v2545_v61  ;;  %1899 = vmatprep.subr.mxu1 %v3353_v55  ;;  %v2586_v11 = vld [vmem:[#allocation2 + $0x98] sm:$0xff]  ;;  %v2606_v17 = vld [vmem:[#allocation2 + $0x60] sm:$0xff]  ;;  %v2619_v21 = vld [vmem:[#allocation2 + $0x148] sm:$0xff] }
  0x2d   :  { %271 = vmatprep.subr.mxu0 %v2548_v62  ;;  %612 = vperm.xlu0 %2182, %v610_v63   ;;  %v2596_v14 = vld [vmem:[#allocation2 + $0x38] sm:$0xff]  ;;  %v2613_v19 = vld [vmem:[#allocation2 + $0x100] sm:$0xff]  ;;  %v2623_v22 = vld [vmem:[#allocation2 + $0x90] sm:$0xff] }
  0x2e   :  { %272 = vmatpush1.msra.mxu0 %v2553_v0  ;;  %1900 = vmatpush3.msra.mxu1 %v2570_v6  ;;  %v2599_v15 = vld [vmem:[#allocation2 + $0x138] sm:$0xff]  ;;  %v2626_v23 = vld [vmem:[#allocation2 + $0x20] sm:$0xff]  ;;  %v2629_v24 = vld [vmem:[#allocation2 + $0x110] sm:$0xff] }
  0x2f   :  { %273 = vmatprep.subr.mxu0 %v2556_v1  ;;  %1901 = vmatprep.subr.mxu1 %v3353_v55  ;;  %v2609_v18 = vld [vmem:[#allocation2 + $0xd8] sm:$0xff]  ;;  %v2636_v26 = vld [vmem:[#allocation2 + $0x168] sm:$0xff]  ;;  %v2639_v27 = vld [vmem:[#allocation2 + $0x40] sm:$0xff] }
  0x30   :  { %274 = vmatpush1.msra.mxu0 %v2559_v2  ;;  %1902 = vmatpush3.msra.mxu1 %v2576_v8  ;;  %v2633_v25 = vld [vmem:[#allocation2 + $0x178] sm:$0xff]  ;;  %v2643_v28 = vld [vmem:[#allocation2 + $0x160] sm:$0xff]  ;;  %v2649_v30 = vld [vmem:[#allocation2 + $0x48] sm:$0xff] }
  0x31   :  { %275 = vmatprep.subr.mxu0 %v2562_v3  ;;  %1903 = vmatprep.subr.mxu1 %v3353_v55  ;;  %v2646_v29 = vld [vmem:[#allocation2 + $0xe0] sm:$0xff]  ;;  %v2653_v31 = vld [vmem:[#allocation2 + $0xd0] sm:$0xff]  ;;  %v2667_v35 = vld [vmem:[#allocation2 + $0x58] sm:$0xff] }
  0x32   :  { %276 = vmatpush1.msra.mxu0 %v2567_v5  ;;  %1904 = vmatpush3.msra.mxu1 %v2586_v11  ;;  %3369 = vst [vmem:[#allocation11_spill] sm:$0xff] %v2653_v31  ;;  %v2656_v32 = vld [vmem:[#allocation2 + $0x130] sm:$0xff]  ;;  %v2664_v34 = vld [vmem:[#allocation3] sm:$0xff]  ;;  %v2674_v37 = vld [vmem:[#allocation2 + $0x118] sm:$0xff] }
  0x33   :  { %277 = vmatprep.subr.mxu0 %v2573_v7  ;;  %1905 = vmatprep.subr.mxu1 %v3353_v55  ;;  %v2660_v33 = vld [vmem:[#allocation2 + $0xb0] sm:$0xff]  ;;  %v2680_v38 = vld [vmem:[#allocation2 + $0x108] sm:$0xff]  ;;  %v212_v42 = vld [vmem:[%s2467_s23] sm:$0xff] }
  0x34   :  { %278 = vmatpush1.msra.mxu0 %v2579_v9  ;;  %1906 = vmatpush3.msra.mxu1 %v2596_v14  ;;  %3370 = vst [vmem:[#allocation12_spill] sm:$0xff] %v2660_v33  ;;  %v2686_v40 = vld [vmem:[#allocation2 + $0x128] sm:$0xff]  ;;  %v2692_v41 = vld [vmem:[#allocation2 + $0x10] sm:$0xff] }
  0x35   :  { %279 = vmatprep.subr.mxu0 %v2583_v10  ;;  %1907 = vmatprep.subr.mxu1 %v3353_v55  ;;  %3371 = vst [vmem:[#allocation13_spill] sm:$0xff] %v2686_v40  ;;  %3372 = vst [vmem:[#allocation14_spill] sm:$0xff] %v2692_v41  ;;  %v213_v46 = vld [vmem:[%s2467_s23 + $0x8] sm:$0xff] }
  0x36   :  { %280 = vmatpush1.msra.mxu0 %v2589_v12  ;;  %1908 = vmatpush3.msra.mxu1 %v2606_v17 }
  0x37   :  { %281 = vmatprep.subr.mxu0 %v2593_v13  ;;  %1909 = vmatprep.subr.mxu1 %v3353_v55 }
  0x38   :  { %282 = vmatpush1.msra.mxu0 %v2599_v15  ;;  %1910 = vmatpush3.msra.mxu1 %v2616_v20 }
  0x39   :  { %283 = vmatprep.subr.mxu0 %v2603_v16  ;;  %1911 = vmatprep.subr.mxu1 %v3353_v55 }
  0x3a   :  { %284 = vmatpush1.msra.mxu0 %v2609_v18  ;;  %1912 = vmatpush3.msra.mxu1 %v2626_v23 }
  0x3b   :  { %285 = vmatprep.subr.mxu0 %v2613_v19  ;;  %1913 = vmatprep.subr.mxu1 %v3353_v55 }
  0x3c   :  { %286 = vmatpush1.msra.mxu0 %v2619_v21  ;;  %1914 = vmatpush3.msra.mxu1 %v2636_v26 }
  0x3d   :  { %287 = vmatprep.subr.mxu0 %v2623_v22  ;;  %1915 = vmatprep.subr.mxu1 %v3353_v55 }
  0x3e   :  { %288 = vmatpush1.msra.mxu0 %v2629_v24  ;;  %1916 = vmatpush3.msra.mxu1 %v2646_v29 }
  0x3f   :  { %289 = vmatprep.subr.mxu0 %v2633_v25  ;;  %1917 = vmatprep.subr.mxu1 %v3353_v55 }
  0x40   :  { %290 = vmatpush1.msra.mxu0 %v2639_v27  ;;  %1918 = vmatpush3.msra.mxu1 %v2656_v32 }
  0x41   :  { %291 = vmatprep.subr.mxu0 %v2643_v28  ;;  %1919 = vmatprep.subr.mxu1 %v3353_v55 }
  0x42   :  { %292 = vmatpush1.msra.mxu0 %v2649_v30  ;;  %1920 = vmatpush3.msra.mxu1 %v2667_v35 }
  0x43   :  { %293 = vmatprep.subr.mxu0 %v2653_v31  ;;  %1921 = vmatprep.subr.mxu1 %v3353_v55 }
  0x44   :  { %294 = vmatpush1.msra.mxu0 %v2660_v33  ;;  %1140 = vperm.xlu0 %2182, %v1138_v36  }
  0x45   :  { %328 = vmatmul.mubr.f32.vlgmr.msra.gmra.mxu0 %v2664_v34  ;;  %1922 = vmatpush3.msra.mxu1 %v2674_v37 }
  0x46   :  { %444 = vmatprep.subr.mxu0 %v2518_v51  ;;  %1923 = vmatprep.subr.mxu1 %v3353_v55 }
  0x47   :  { %445 = vmatpush1.msra.mxu0 %v2520_v52  ;;  %1924 = vmatpush3.msra.mxu1 %v2680_v38 }
  0x48   :  { %446 = vmatprep.subr.mxu0 %v2522_v53  ;;  %1925 = vmatprep.subr.mxu1 %v3353_v55 }
  0x49   :  { %1492 = vperm.xlu0 %2182, %v1490_v39   ;;  %1926 = vmatpush3.msra.mxu1 %v2686_v40 }
  0x4a   :  { %447 = vmatpush1.msra.mxu0 %v2525_v54  ;;  %1927 = vmatprep.subr.mxu1 %v3353_v55 }
  0x4b   :  { %448 = vmatprep.subr.mxu0 %v2530_v56  ;;  %1928 = vmatpush3.msra.mxu1 %v2692_v41 }
  0x4c   :  { %449 = vmatpush1.msra.mxu0 %v2535_v59  ;;  %1930 = vmatmul.mubr.f32.vlgmr.msra.gmra.mxu1 %v2664_v34 }
  0x4d   :  { %1932 = vmatprep.subr.mxu1 %v3353_v55  ;;  %450 = vmatprep.subr.mxu0 %v2541_v60 }
  0x4e   :  { %1933 = vmatpush3.msra.mxu1 %v2564_v4  ;;  %451 = vmatpush1.msra.mxu0 %v2545_v61 }
  0x4f   :  { %1934 = vmatprep.subr.mxu1 %v3353_v55  ;;  %452 = vmatprep.subr.mxu0 %v2548_v62 }
  0x50   :  { %1935 = vmatpush3.msra.mxu1 %v2570_v6  ;;  %453 = vmatpush1.msra.mxu0 %v2553_v0 }
  0x51   :  { %1936 = vmatprep.subr.mxu1 %v3353_v55  ;;  %454 = vmatprep.subr.mxu0 %v2556_v1 }
  0x52   :  { %1937 = vmatpush3.msra.mxu1 %v2576_v8  ;;  %455 = vmatpush1.msra.mxu0 %v2559_v2 }
  0x53   :  { %1938 = vmatprep.subr.mxu1 %v3353_v55  ;;  %456 = vmatprep.subr.mxu0 %v2562_v3 }
  0x54   :  { %1939 = vmatpush3.msra.mxu1 %v2586_v11  ;;  %457 = vmatpush1.msra.mxu0 %v2567_v5 }
  0x55   :  { %1940 = vmatprep.subr.mxu1 %v3353_v55  ;;  %458 = vmatprep.subr.mxu0 %v2573_v7 }
  0x56   :  { %1941 = vmatpush3.msra.mxu1 %v2596_v14  ;;  %459 = vmatpush1.msra.mxu0 %v2579_v9 }
  0x57   :  { %1942 = vmatprep.subr.mxu1 %v3353_v55  ;;  %460 = vmatprep.subr.mxu0 %v2583_v10 }
  0x58   :  { %1943 = vmatpush3.msra.mxu1 %v2606_v17  ;;  %461 = vmatpush1.msra.mxu0 %v2589_v12 }
  0x59   :  { %1944 = vmatprep.subr.mxu1 %v3353_v55  ;;  %462 = vmatprep.subr.mxu0 %v2593_v13 }
  0x5a   :  { %1945 = vmatpush3.msra.mxu1 %v2616_v20  ;;  %463 = vmatpush1.msra.mxu0 %v2599_v15 }
  0x5b   :  { %1946 = vmatprep.subr.mxu1 %v3353_v55  ;;  %464 = vmatprep.subr.mxu0 %v2603_v16 }
  0x5c   :  { %1947 = vmatpush3.msra.mxu1 %v2626_v23  ;;  %465 = vmatpush1.msra.mxu0 %v2609_v18 }
  0x5d   :  { %1948 = vmatprep.subr.mxu1 %v3353_v55  ;;  %466 = vmatprep.subr.mxu0 %v2613_v19 }
  0x5e   :  { %1949 = vmatpush3.msra.mxu1 %v2636_v26  ;;  %467 = vmatpush1.msra.mxu0 %v2619_v21 }
  0x5f   :  { %1950 = vmatprep.subr.mxu1 %v3353_v55  ;;  %468 = vmatprep.subr.mxu0 %v2623_v22 }
  0x60   :  { %1951 = vmatpush3.msra.mxu1 %v2646_v29  ;;  %469 = vmatpush1.msra.mxu0 %v2629_v24 }
  0x61   :  { %1952 = vmatprep.subr.mxu1 %v3353_v55  ;;  %470 = vmatprep.subr.mxu0 %v2633_v25 }
  0x62   :  { %1953 = vmatpush3.msra.mxu1 %v2656_v32  ;;  %471 = vmatpush1.msra.mxu0 %v2639_v27 }
  0x63   :  { %1954 = vmatprep.subr.mxu1 %v3353_v55  ;;  %472 = vmatprep.subr.mxu0 %v2643_v28 }
  0x64   :  { %1955 = vmatpush3.msra.mxu1 %v2667_v35  ;;  %473 = vmatpush1.msra.mxu0 %v2649_v30 }
  0x65   :  { %1956 = vmatprep.subr.mxu1 %v3353_v55  ;;  %474 = vmatprep.subr.mxu0 %v2653_v31 }
  0x66   :  { %1957 = vmatpush3.msra.mxu1 %v2674_v37  ;;  %475 = vmatpush1.msra.mxu0 %v2660_v33  ;;  %v214_v33 = vld [vmem:[%s2467_s23 + $0x10] sm:$0xff] }
  0x67   :  { %1958 = vmatprep.subr.mxu1 %v3353_v55  ;;  %508 = vmatprep.mubr.f32.mxu0 %v3353_v55 }
  0x68   :  { %1959 = vmatpush3.msra.mxu1 %v2680_v38  ;;  %1964 = vmatprep.mubr.msk.f32.mxu1 %vm2319_vm1, %v3353_v55 }
  0x69   :  { %1960 = vmatprep.subr.mxu1 %v3353_v55  ;;  %620 = vmatprep.subr.mxu0 %v2518_v51 }
  0x6a   :  { %1961 = vmatpush3.msra.mxu1 %v2686_v40 }
  0x6b   :  { %1962 = vmatprep.subr.mxu1 %v3353_v55 }
  0x6c   :  { %1963 = vmatpush3.msra.mxu1 %v2692_v41 }
  0x6d   :  { %1967 = vmatprep.subr.mxu1 %v3353_v55 }
 0x105   :  { %v329_v43 = vpop.f32.mrf.mxu0 }
 0x106   :  { %v404_v44 = vadd.f32 %v329_v43, %v212_v42 }
 0x107   :  { %v331_v47 = vpop.f32.mrf.mxu0 }
 0x108   :  { %v1714_v45 = vmul.f32 -1.442695, %v404_v44  ;;  %v411_v48 = vadd.f32 %v331_v47, %v213_v46  ;;  %v437_v47 = vpop.permute.xlu0 %436 }
 0x109   :  { %vm438_vm5 = vcmp.eq.s32.totalorder %v437_v47, 1 }
 0x10a   :  { %2184 = vpow2.f32 %v1714_v45  ;;  %v1715_v63 = vmul.f32 -1.442695, %v411_v48 }
 0x10c   :  { %v400_v58 = vpop.f32.mrf.mxu1  ;;  %2186 = vpow2.f32 %v1715_v63 }
 0x10d   :  { %v424_v55 = vadd.f32 %v2513_v50, %v400_v58 }
 0x10e   :  { %v1931_v36 = vpop.f32.mrf.mxu1 }
 0x117   :  { %v2185_v39 = vpop.eup %2184 }
 0x118   :  { %v408_v57 = vadd.f32 1.0, %v2185_v39 }
 0x119   :  { %v2187_v49 = vpop.eup %2186 }
 0x11a   :  { %2188 = vrcp.f32 %v408_v57  ;;  %v415_v51 = vadd.f32 1.0, %v2187_v49  ;;  %v3373_v49 = vmov 0.0  }
 0x11c   :  { %2190 = vrcp.f32 %v415_v51  ;;  %v3374_v51 = vld [vmem:[#allocation12_spill] sm:$0xff] }
 0x127   :  { %v2189_v41 = vpop.eup %2188 }
 0x128   :  { %v425_v42 = vmul.f32 %v2189_v41, %v424_v55  ;;  %v3375_v55 = vld [vmem:[#allocation14_spill] sm:$0xff]  ;;  %v3378_v41 = vmov 0  }
 0x129   :  { %v2191_v44 = vpop.eup %2190 }
 0x12a   :  { %v426_v43 = vadd.f32 %v425_v42, %v214_v33  ;;  %v428_v45 = vsub.f32 1.0, %v2191_v44  ;;  %v430_v63 = vmul.f32 %v2191_v44, %v2664_v34  ;;  %v3376_v33 = vld [vmem:[#allocation10_spill] sm:$0xff]  ;;  %v1718_v44 = vld [vmem:[%s2467_s23 + $0x18] sm:$0xff] }
 0x12c   :  { %2192 = vtanh.f32 %v426_v43 }
 0x139   :  { %v2193_v46 = vpop.eup %2192 }
 0x13a   :  { %v429_v48 = vmul.f32 %v2193_v46, %v428_v45 }
 0x13c   :  { %v431_v36 = vadd.f32 %v430_v63, %v429_v48 }
 0x13e   :  { %v2770_v57 = vsel %vm438_vm5, %v431_v36, %v2664_v34  ;;  %v3377_v34 = vld [vmem:[#allocation9_spill] sm:$0xff]  ;;  %v1719_v36 = vld [vmem:[%s2467_s23 + $0x20] sm:$0xff] }
 0x13f   :  { %509 = vmatmul.mubr.f32.vlgmr.msra.gmra.mxu0 %v2770_v57  ;;  %1965 = vmatmul.mubr.f32.vlgmr.msra.gmra.mxu1 %v2770_v57  ;;  %vm1729_vm6 = vcmp.gt.s32.totalorder %v3377_v34, 2  ;;  %vm1735_vm7 = vcmp.gt.s32.totalorder %v3377_v34, 3  ;;  %vm1747_vm8 = vcmp.gt.s32.totalorder %v3377_v34, 5  ;;  %vm1759_vm9 = vcmp.gt.s32.totalorder %v3377_v34, 7 }
 0x140   :  { %621 = vmatpush1.msra.mxu0 %v2520_v52  ;;  %1968 = vmatpush3.msra.mxu1 %v2564_v4  ;;  %v786_v58 = vsel %vm1729_vm6, 1, %v3378_v41  ;;  %v962_v39 = vsel %vm1735_vm7, 1, %v3378_v41  ;;  %v1314_v42 = vsel %vm1747_vm8, 1, %v3378_v41  ;;  %v1666_v43 = vsel %vm1759_vm9, 1, %v3378_v41 }
 0x141   :  { %622 = vmatprep.subr.mxu0 %v2522_v53  ;;  %1969 = vmatprep.subr.mxu1 %v3373_v49 }
 0x142   :  { %623 = vmatpush1.msra.mxu0 %v2525_v54  ;;  %1970 = vmatpush3.msra.mxu1 %v2570_v6 }
 0x143   :  { %624 = vmatprep.subr.mxu0 %v2530_v56  ;;  %1971 = vmatprep.subr.mxu1 %v3373_v49 }
 0x144   :  { %625 = vmatpush1.msra.mxu0 %v2535_v59  ;;  %1972 = vmatpush3.msra.mxu1 %v2576_v8 }
 0x145   :  { %626 = vmatprep.subr.mxu0 %v2541_v60  ;;  %1973 = vmatprep.subr.mxu1 %v3373_v49 }
 0x146   :  { %627 = vmatpush1.msra.mxu0 %v2545_v61  ;;  %1974 = vmatpush3.msra.mxu1 %v2586_v11 }
 0x147   :  { %628 = vmatprep.subr.mxu0 %v2548_v62  ;;  %1975 = vmatprep.subr.mxu1 %v3373_v49 }
 0x148   :  { %629 = vmatpush1.msra.mxu0 %v2553_v0  ;;  %1976 = vmatpush3.msra.mxu1 %v2596_v14 }
 0x149   :  { %630 = vmatprep.subr.mxu0 %v2556_v1  ;;  %1977 = vmatprep.subr.mxu1 %v3373_v49 }
 0x14a   :  { %631 = vmatpush1.msra.mxu0 %v2559_v2  ;;  %1978 = vmatpush3.msra.mxu1 %v2606_v17 }
 0x14b   :  { %632 = vmatprep.subr.mxu0 %v2562_v3  ;;  %1979 = vmatprep.subr.mxu1 %v3373_v49 }
 0x14c   :  { %633 = vmatpush1.msra.mxu0 %v2567_v5  ;;  %1980 = vmatpush3.msra.mxu1 %v2616_v20 }
 0x14d   :  { %634 = vmatprep.subr.mxu0 %v2573_v7  ;;  %1981 = vmatprep.subr.mxu1 %v3373_v49 }
 0x14e   :  { %635 = vmatpush1.msra.mxu0 %v2579_v9  ;;  %1982 = vmatpush3.msra.mxu1 %v2626_v23 }
 0x14f   :  { %636 = vmatprep.subr.mxu0 %v2583_v10  ;;  %1983 = vmatprep.subr.mxu1 %v3373_v49 }
 0x150   :  { %637 = vmatpush1.msra.mxu0 %v2589_v12  ;;  %1984 = vmatpush3.msra.mxu1 %v2636_v26 }
 0x151   :  { %638 = vmatprep.subr.mxu0 %v2593_v13  ;;  %1985 = vmatprep.subr.mxu1 %v3373_v49 }
 0x152   :  { %639 = vmatpush1.msra.mxu0 %v2599_v15  ;;  %1986 = vmatpush3.msra.mxu1 %v2646_v29 }
 0x153   :  { %640 = vmatprep.subr.mxu0 %v2603_v16  ;;  %1987 = vmatprep.subr.mxu1 %v3373_v49 }
 0x154   :  { %641 = vmatpush1.msra.mxu0 %v2609_v18  ;;  %1988 = vmatpush3.msra.mxu1 %v2656_v32 }
 0x155   :  { %642 = vmatprep.subr.mxu0 %v2613_v19  ;;  %1989 = vmatprep.subr.mxu1 %v3373_v49 }
 0x156   :  { %643 = vmatpush1.msra.mxu0 %v2619_v21  ;;  %1990 = vmatpush3.msra.mxu1 %v2667_v35 }
 0x157   :  { %644 = vmatprep.subr.mxu0 %v2623_v22  ;;  %1991 = vmatprep.subr.mxu1 %v3373_v49 }
 0x158   :  { %645 = vmatpush1.msra.mxu0 %v2629_v24  ;;  %1992 = vmatpush3.msra.mxu1 %v2674_v37 }
 0x159   :  { %646 = vmatprep.subr.mxu0 %v2633_v25  ;;  %1993 = vmatprep.subr.mxu1 %v3373_v49 }
 0x15a   :  { %647 = vmatpush1.msra.mxu0 %v2639_v27  ;;  %1994 = vmatpush3.msra.mxu1 %v2680_v38 }
 0x15b   :  { %648 = vmatprep.subr.mxu0 %v2643_v28  ;;  %1995 = vmatprep.subr.mxu1 %v3373_v49 }
 0x15c   :  { %649 = vmatpush1.msra.mxu0 %v2649_v30  ;;  %1996 = vmatpush3.msra.mxu1 %v2686_v40 }
 0x15d   :  { %650 = vmatprep.subr.mxu0 %v2653_v31  ;;  %1997 = vmatprep.subr.mxu1 %v3373_v49  ;;  %v1720_v31 = vld [vmem:[%s2467_s23 + $0x28] sm:$0xff] }
 0x15e   :  { %651 = vmatpush1.msra.mxu0 %v3374_v51  ;;  %684 = vmatprep.mubr.f32.mxu0 %v3373_v49 }
 0x15f   :  { %1998 = vmatpush3.msra.mxu1 %v3375_v55  ;;  %1999 = vmatprep.mubr.msk.f32.mxu1 %vm2319_vm1, %v3373_v49 }
 0x160   :  { %796 = vmatprep.subr.mxu0 %v3376_v33  ;;  %2002 = vmatprep.subr.mxu1 %v3373_v49 }
 0x161   :  { %788 = vperm.xlu1 %2183, %v786_v58  }
 0x165   :  { %964 = vperm.xlu1 %2183, %v962_v39  }
 0x169   :  { %1316 = vperm.xlu1 %2183, %v1314_v42  }
 0x16d   :  { %1668 = vperm.xlu1 %2183, %v1666_v43  }
 0x1ff   :  { %v510_v45 = vpop.f32.mrf.mxu0  ;;  %v581_v46 = vpop.f32.mrf.mxu1 }
 0x200   :  { %v585_v47 = vadd.f32 %v1718_v44, %v510_v45  ;;  %v599_v41 = vadd.f32 %v2513_v50, %v581_v46  ;;  %v3383_v46 = vld [vmem:[#allocation10_spill] sm:$0xff] }
 0x201   :  { %v1966_v48 = vpop.f32.mrf.mxu1  ;;  %v512_v58 = vpop.f32.mrf.mxu0 }
 0x202   :  { %v1721_v63 = vmul.f32 -1.442695, %v585_v47  ;;  %v592_v33 = vadd.f32 %v1719_v36, %v512_v58  ;;  %v613_v36 = vpop.permute.xlu0 %612 }
 0x203   :  { %vm614_vm10 = vcmp.eq.s32.totalorder %v613_v36, 1 }
 0x204   :  { %2194 = vpow2.f32 %v1721_v63  ;;  %v1722_v39 = vmul.f32 -1.442695, %v592_v33 }
 0x206   :  { %2196 = vpow2.f32 %v1722_v39  ;;  %v1724_v39 = vld [vmem:[%s2467_s23 + $0x30] sm:$0xff] }
 0x211   :  { %v2195_v55 = vpop.eup %2194 }
 0x212   :  { %v589_v51 = vadd.f32 1.0, %v2195_v55  ;;  %v3382_v55 = vld [vmem:[#allocation14_spill] sm:$0xff] }
 0x213   :  { %v2197_v34 = vpop.eup %2196 }
 0x214   :  { %2198 = vrcp.f32 %v589_v51  ;;  %v596_v42 = vadd.f32 1.0, %v2197_v34 }
 0x216   :  { %2200 = vrcp.f32 %v596_v42 }
 0x221   :  { %v2199_v43 = vpop.eup %2198 }
 0x222   :  { %v600_v40 = vmul.f32 %v2199_v43, %v599_v41 }
 0x223   :  { %v2201_v45 = vpop.eup %2200 }
 0x224   :  { %v601_v44 = vadd.f32 %v1720_v31, %v600_v40  ;;  %v603_v47 = vsub.f32 1.0, %v2201_v45  ;;  %v605_v33 = vmul.f32 %v2201_v45, %v2770_v57  ;;  %v3379_v31 = vld [vmem:[#allocation13_spill] sm:$0xff]  ;;  %v3380_v40 = vld [vmem:[#allocation11_spill] sm:$0xff] }
 0x225   :  { %v1725_v45 = vld [vmem:[%s2467_s23 + $0x38] sm:$0xff] }
 0x226   :  { %2202 = vtanh.f32 %v601_v44 }
 0x233   :  { %v2203_v48 = vpop.eup %2202 }
 0x234   :  { %v604_v63 = vmul.f32 %v2203_v48, %v603_v47 }
 0x236   :  { %v606_v58 = vadd.f32 %v605_v33, %v604_v63 }
 0x238   :  { %v2855_v51 = vsel %vm614_vm10, %v606_v58, %v2770_v57  ;;  %v3381_v57 = vld [vmem:[#allocation12_spill] sm:$0xff] }
 0x239   :  { %685 = vmatmul.mubr.f32.vlgmr.msra.gmra.mxu0 %v2855_v51  ;;  %2000 = vmatmul.mubr.f32.vlgmr.msra.gmra.mxu1 %v2855_v51 }
 0x23a   :  { %797 = vmatpush1.msra.mxu0 %v2520_v52  ;;  %2003 = vmatpush3.msra.mxu1 %v2564_v4 }
 0x23b   :  { %798 = vmatprep.subr.mxu0 %v2522_v53  ;;  %2004 = vmatprep.subr.mxu1 %v3373_v49 }
 0x23c   :  { %799 = vmatpush1.msra.mxu0 %v2525_v54  ;;  %2005 = vmatpush3.msra.mxu1 %v2570_v6 }
 0x23d   :  { %800 = vmatprep.subr.mxu0 %v2530_v56  ;;  %2006 = vmatprep.subr.mxu1 %v3373_v49 }
 0x23e   :  { %801 = vmatpush1.msra.mxu0 %v2535_v59  ;;  %2007 = vmatpush3.msra.mxu1 %v2576_v8 }
 0x23f   :  { %802 = vmatprep.subr.mxu0 %v2541_v60  ;;  %2008 = vmatprep.subr.mxu1 %v3373_v49 }
 0x240   :  { %803 = vmatpush1.msra.mxu0 %v2545_v61  ;;  %2009 = vmatpush3.msra.mxu1 %v2586_v11 }
 0x241   :  { %804 = vmatprep.subr.mxu0 %v2548_v62  ;;  %2010 = vmatprep.subr.mxu1 %v3373_v49 }
 0x242   :  { %805 = vmatpush1.msra.mxu0 %v2553_v0  ;;  %2011 = vmatpush3.msra.mxu1 %v2596_v14 }
 0x243   :  { %806 = vmatprep.subr.mxu0 %v2556_v1  ;;  %2012 = vmatprep.subr.mxu1 %v3373_v49 }
 0x244   :  { %807 = vmatpush1.msra.mxu0 %v2559_v2  ;;  %2013 = vmatpush3.msra.mxu1 %v2606_v17 }
 0x245   :  { %808 = vmatprep.subr.mxu0 %v2562_v3  ;;  %2014 = vmatprep.subr.mxu1 %v3373_v49 }
 0x246   :  { %809 = vmatpush1.msra.mxu0 %v2567_v5  ;;  %2015 = vmatpush3.msra.mxu1 %v2616_v20 }
 0x247   :  { %810 = vmatprep.subr.mxu0 %v2573_v7  ;;  %2016 = vmatprep.subr.mxu1 %v3373_v49 }
 0x248   :  { %811 = vmatpush1.msra.mxu0 %v2579_v9  ;;  %2017 = vmatpush3.msra.mxu1 %v2626_v23 }
 0x249   :  { %812 = vmatprep.subr.mxu0 %v2583_v10  ;;  %2018 = vmatprep.subr.mxu1 %v3373_v49 }
 0x24a   :  { %813 = vmatpush1.msra.mxu0 %v2589_v12  ;;  %2019 = vmatpush3.msra.mxu1 %v2636_v26 }
 0x24b   :  { %814 = vmatprep.subr.mxu0 %v2593_v13  ;;  %2020 = vmatprep.subr.mxu1 %v3373_v49 }
 0x24c   :  { %815 = vmatpush1.msra.mxu0 %v2599_v15  ;;  %2021 = vmatpush3.msra.mxu1 %v2646_v29 }
 0x24d   :  { %816 = vmatprep.subr.mxu0 %v2603_v16  ;;  %2022 = vmatprep.subr.mxu1 %v3373_v49 }
 0x24e   :  { %817 = vmatpush1.msra.mxu0 %v2609_v18  ;;  %2023 = vmatpush3.msra.mxu1 %v2656_v32 }
 0x24f   :  { %818 = vmatprep.subr.mxu0 %v2613_v19  ;;  %2024 = vmatprep.subr.mxu1 %v3373_v49 }
 0x250   :  { %819 = vmatpush1.msra.mxu0 %v2619_v21  ;;  %2025 = vmatpush3.msra.mxu1 %v2667_v35 }
 0x251   :  { %820 = vmatprep.subr.mxu0 %v2623_v22  ;;  %2026 = vmatprep.subr.mxu1 %v3373_v49 }
 0x252   :  { %821 = vmatpush1.msra.mxu0 %v2629_v24  ;;  %2027 = vmatpush3.msra.mxu1 %v2674_v37 }
 0x253   :  { %822 = vmatprep.subr.mxu0 %v2633_v25  ;;  %2028 = vmatprep.subr.mxu1 %v3373_v49 }
 0x254   :  { %823 = vmatpush1.msra.mxu0 %v2639_v27  ;;  %2029 = vmatpush3.msra.mxu1 %v2680_v38 }
 0x255   :  { %824 = vmatprep.subr.mxu0 %v2643_v28  ;;  %2030 = vmatprep.subr.mxu1 %v3373_v49 }
 0x256   :  { %825 = vmatpush1.msra.mxu0 %v2649_v30  ;;  %2031 = vmatpush3.msra.mxu1 %v3379_v31 }
 0x257   :  { %826 = vmatprep.subr.mxu0 %v3380_v40  ;;  %2032 = vmatprep.subr.mxu1 %v3373_v49  ;;  %v1726_v40 = vld [vmem:[%s2467_s23 + $0x40] sm:$0xff] }
 0x258   :  { %827 = vmatpush1.msra.mxu0 %v3381_v57  ;;  %860 = vmatprep.mubr.f32.mxu0 %v3373_v49 }
 0x259   :  { %2033 = vmatpush3.msra.mxu1 %v3382_v55  ;;  %2034 = vmatprep.mubr.msk.f32.mxu1 %vm2319_vm1, %v3373_v49 }
 0x25a   :  { %972 = vmatprep.subr.mxu0 %v3383_v46  ;;  %2037 = vmatprep.subr.mxu1 %v3373_v49 }
 0x2f9   :  { %v686_v34 = vpop.f32.mrf.mxu0  ;;  %v757_v42 = vpop.f32.mrf.mxu1 }
 0x2fa   :  { %v761_v41 = vadd.f32 %v1724_v39, %v686_v34  ;;  %v775_v55 = vadd.f32 %v2513_v50, %v757_v42  ;;  %v3035_v42 = vld [vmem:[#allocation2 + $0x8] sm:$0xff] }
 0x2fb   :  { %v2001_v43 = vpop.f32.mrf.mxu1  ;;  %v688_v47 = vpop.f32.mrf.mxu0 }
 0x2fc   :  { %v1727_v44 = vmul.f32 -1.442695, %v761_v41  ;;  %v768_v48 = vadd.f32 %v1725_v45, %v688_v47 }
 0x2fe   :  { %2204 = vpow2.f32 %v1727_v44  ;;  %v1728_v63 = vmul.f32 -1.442695, %v768_v48  ;;  %v789_v44 = vpop.permute.xlu1 %788 }
 0x2ff   :  { %vm790_vm11 = vcmp.eq.s32.totalorder %v789_v44, 1  ;;  %v3067_v44 = vld [vmem:[#allocation2 + $0xa0] sm:$0xff] }
 0x300   :  { %2206 = vpow2.f32 %v1728_v63 }
 0x30b   :  { %v2205_v33 = vpop.eup %2204 }
 0x30c   :  { %v765_v36 = vadd.f32 1.0, %v2205_v33  ;;  %v3038_v33 = vld [vmem:[#allocation2 + $0x78] sm:$0xff] }
 0x30d   :  { %v2207_v58 = vpop.eup %2206 }
 0x30e   :  { %2208 = vrcp.f32 %v765_v36  ;;  %v772_v46 = vadd.f32 1.0, %v2207_v58  ;;  %v3041_v36 = vld [vmem:[#allocation2 + $0x18] sm:$0xff]  ;;  %v3045_v58 = vld [vmem:[#allocation2 + $0xc0] sm:$0xff] }
 0x310   :  { %2210 = vrcp.f32 %v772_v46  ;;  %v3048_v46 = vld [vmem:[#allocation2 + $0x98] sm:$0xff] }
 0x31b   :  { %v2209_v57 = vpop.eup %2208 }
 0x31c   :  { %v776_v31 = vmul.f32 %v2209_v57, %v775_v55  ;;  %v3028_v57 = vld [vmem:[#allocation2 + $0x70] sm:$0xff]  ;;  %v3031_v55 = vld [vmem:[#allocation2] sm:$0xff] }
 0x31d   :  { %v2211_v34 = vpop.eup %2210 }
 0x31e   :  { %v777_v39 = vadd.f32 %v1726_v40, %v776_v31  ;;  %v779_v41 = vsub.f32 1.0, %v2211_v34  ;;  %v781_v47 = vmul.f32 %v2211_v34, %v2855_v51  ;;  %v3021_v31 = vld [vmem:[#allocation2 + $0x68] sm:$0xff]  ;;  %v3025_v40 = vld [vmem:[#allocation2 + $0x50] sm:$0xff] }
 0x31f   :  { %v3055_v34 = vld [vmem:[#allocation2 + $0xc8] sm:$0xff] }
 0x320   :  { %2212 = vtanh.f32 %v777_v39  ;;  %v3051_v39 = vld [vmem:[#allocation2 + $0x28] sm:$0xff] }
 0x32d   :  { %v2213_v43 = vpop.eup %2212 }
 0x32e   :  { %v780_v45 = vmul.f32 %v2213_v43, %v779_v41  ;;  %v3059_v41 = vld [vmem:[#allocation2 + $0x140] sm:$0xff]  ;;  %v3063_v43 = vld [vmem:[#allocation2 + $0xf0] sm:$0xff] }
 0x330   :  { %v782_v48 = vadd.f32 %v781_v47, %v780_v45  ;;  %v3071_v45 = vld [vmem:[#allocation2 + $0x88] sm:$0xff] }
 0x331   :  { %v3079_v47 = vld [vmem:[#allocation2 + $0xe8] sm:$0xff] }
 0x332   :  { %v2932_v63 = vsel %vm790_vm11, %v782_v48, %v2855_v51  ;;  %v3018_v51 = vld [vmem:[#allocation2 + $0x150] sm:$0xff]  ;;  %v3087_v48 = vld [vmem:[#allocation2 + $0xa8] sm:$0xff] }
 0x333   :  { %861 = vmatmul.mubr.f32.vlgmr.msra.gmra.mxu0 %v2932_v63  ;;  %2035 = vmatmul.mubr.f32.vlgmr.msra.gmra.mxu1 %v2932_v63 }
 0x334   :  { %973 = vmatpush1.msra.mxu0 %v2520_v52  ;;  %2038 = vmatpush3.msra.mxu1 %v2564_v4  ;;  %v3384_v52 = vld [vmem:[#allocation13_spill] sm:$0xff] }
 0x335   :  { %974 = vmatprep.subr.mxu0 %v2522_v53  ;;  %2039 = vmatprep.subr.mxu1 %v3373_v49  ;;  %v3385_v53 = vld [vmem:[#allocation11_spill] sm:$0xff] }
 0x336   :  { %975 = vmatpush1.msra.mxu0 %v2525_v54  ;;  %2040 = vmatpush3.msra.mxu1 %v2570_v6  ;;  %v3386_v54 = vld [vmem:[#allocation12_spill] sm:$0xff] }
 0x337   :  { %976 = vmatprep.subr.mxu0 %v2530_v56  ;;  %2041 = vmatprep.subr.mxu1 %v3373_v49  ;;  %v3387_v56 = vld [vmem:[#allocation14_spill] sm:$0xff] }
 0x338   :  { %977 = vmatpush1.msra.mxu0 %v2535_v59  ;;  %2042 = vmatpush3.msra.mxu1 %v2576_v8  ;;  %v3001_v59 = vld [vmem:[#allocation2 + $0x158] sm:$0xff] }
 0x339   :  { %978 = vmatprep.subr.mxu0 %v2541_v60  ;;  %2043 = vmatprep.subr.mxu1 %v3373_v49  ;;  %v1730_v60 = vld [vmem:[%s2467_s23 + $0x48] sm:$0xff] }
 0x33a   :  { %979 = vmatpush1.msra.mxu0 %v2545_v61  ;;  %2044 = vmatpush3.msra.mxu1 %v2586_v11 }
 0x33b   :  { %980 = vmatprep.subr.mxu0 %v2548_v62  ;;  %2045 = vmatprep.subr.mxu1 %v3373_v49 }
 0x33c   :  { %981 = vmatpush1.msra.mxu0 %v2553_v0  ;;  %2046 = vmatpush3.msra.mxu1 %v2596_v14 }
 0x33d   :  { %982 = vmatprep.subr.mxu0 %v2556_v1  ;;  %2047 = vmatprep.subr.mxu1 %v3373_v49 }
 0x33e   :  { %983 = vmatpush1.msra.mxu0 %v2559_v2  ;;  %2048 = vmatpush3.msra.mxu1 %v2606_v17 }
 0x33f   :  { %984 = vmatprep.subr.mxu0 %v2562_v3  ;;  %2049 = vmatprep.subr.mxu1 %v3373_v49  ;;  %v1731_v3 = vld [vmem:[%s2467_s23 + $0x50] sm:$0xff] }
 0x340   :  { %985 = vmatpush1.msra.mxu0 %v2567_v5  ;;  %2050 = vmatpush3.msra.mxu1 %v2616_v20 }
 0x341   :  { %986 = vmatprep.subr.mxu0 %v2573_v7  ;;  %2051 = vmatprep.subr.mxu1 %v3373_v49 }
 0x342   :  { %987 = vmatpush1.msra.mxu0 %v2579_v9  ;;  %2052 = vmatpush3.msra.mxu1 %v2626_v23 }
 0x343   :  { %988 = vmatprep.subr.mxu0 %v2583_v10  ;;  %2053 = vmatprep.subr.mxu1 %v3373_v49 }
 0x344   :  { %989 = vmatpush1.msra.mxu0 %v2589_v12  ;;  %2054 = vmatpush3.msra.mxu1 %v2636_v26 }
 0x345   :  { %990 = vmatprep.subr.mxu0 %v2593_v13  ;;  %2055 = vmatprep.subr.mxu1 %v3373_v49  ;;  %v1732_v13 = vld [vmem:[%s2467_s23 + $0x58] sm:$0xff] }
 0x346   :  { %991 = vmatpush1.msra.mxu0 %v2599_v15  ;;  %2056 = vmatpush3.msra.mxu1 %v2646_v29 }
 0x347   :  { %992 = vmatprep.subr.mxu0 %v2603_v16  ;;  %2057 = vmatprep.subr.mxu1 %v3373_v49 }
 0x348   :  { %993 = vmatpush1.msra.mxu0 %v2609_v18  ;;  %2058 = vmatpush3.msra.mxu1 %v2656_v32 }
 0x349   :  { %994 = vmatprep.subr.mxu0 %v2613_v19  ;;  %2059 = vmatprep.subr.mxu1 %v3373_v49 }
 0x34a   :  { %995 = vmatpush1.msra.mxu0 %v2619_v21  ;;  %2060 = vmatpush3.msra.mxu1 %v2667_v35 }
 0x34b   :  { %996 = vmatprep.subr.mxu0 %v2623_v22  ;;  %2061 = vmatprep.subr.mxu1 %v3373_v49 }
 0x34c   :  { %997 = vmatpush1.msra.mxu0 %v2629_v24  ;;  %2062 = vmatpush3.msra.mxu1 %v2674_v37 }
 0x34d   :  { %998 = vmatprep.subr.mxu0 %v2633_v25  ;;  %2063 = vmatprep.subr.mxu1 %v3373_v49  ;;  %v965_v25 = vpop.permute.xlu1 %964 }
 0x34e   :  { %999 = vmatpush1.msra.mxu0 %v2639_v27  ;;  %2064 = vmatpush3.msra.mxu1 %v2680_v38  ;;  %vm966_vm12 = vcmp.eq.s32.totalorder %v965_v25, 1 }
 0x34f   :  { %1000 = vmatprep.subr.mxu0 %v2643_v28  ;;  %2065 = vmatprep.subr.mxu1 %v3373_v49 }
 0x350   :  { %1001 = vmatpush1.msra.mxu0 %v2649_v30  ;;  %2066 = vmatpush3.msra.mxu1 %v3384_v52  ;;  %v3015_v30 = vld [vmem:[#allocation2 + $0x30] sm:$0xff] }
 0x351   :  { %1002 = vmatprep.subr.mxu0 %v3385_v53  ;;  %2067 = vmatprep.subr.mxu1 %v3373_v49 }
 0x352   :  { %1003 = vmatpush1.msra.mxu0 %v3386_v54  ;;  %1036 = vmatprep.mubr.f32.mxu0 %v3373_v49 }
 0x353   :  { %2068 = vmatpush3.msra.mxu1 %v3387_v56  ;;  %2069 = vmatprep.mubr.msk.f32.mxu1 %vm2319_vm1, %v3373_v49 }
 0x354   :  { %1148 = vmatprep.subr.mxu0 %v3001_v59  ;;  %2072 = vmatprep.subr.mxu1 %v3373_v49 }
 0x3f3   :  { %v862_v61 = vpop.f32.mrf.mxu0  ;;  %v933_v62 = vpop.f32.mrf.mxu1 }
 0x3f4   :  { %v937_v0 = vadd.f32 %v1730_v60, %v862_v61  ;;  %v951_v11 = vadd.f32 %v2513_v50, %v933_v62  ;;  %v3103_v60 = vld [vmem:[#allocation2 + $0xd8] sm:$0xff]  ;;  %v3111_v61 = vld [vmem:[#allocation2 + $0x148] sm:$0xff]  ;;  %v3119_v62 = vld [vmem:[#allocation2 + $0x110] sm:$0xff] }
 0x3f5   :  { %v2036_v1 = vpop.f32.mrf.mxu1  ;;  %v864_v4 = vpop.f32.mrf.mxu0 }
 0x3f6   :  { %v1733_v2 = vmul.f32 -1.442695, %v937_v0  ;;  %v944_v5 = vadd.f32 %v1731_v3, %v864_v4  ;;  %v3127_v0 = vld [vmem:[#allocation2 + $0x40] sm:$0xff]  ;;  %v1737_v4 = vld [vmem:[%s2467_s23 + $0x68] sm:$0xff] }
 0x3f8   :  { %2214 = vpow2.f32 %v1733_v2  ;;  %v1734_v6 = vmul.f32 -1.442695, %v944_v5 }
 0x3fa   :  { %2216 = vpow2.f32 %v1734_v6 }
 0x405   :  { %v2215_v7 = vpop.eup %2214 }
 0x406   :  { %v941_v8 = vadd.f32 1.0, %v2215_v7 }
 0x407   :  { %v2217_v9 = vpop.eup %2216 }
 0x408   :  { %2218 = vrcp.f32 %v941_v8  ;;  %v948_v10 = vadd.f32 1.0, %v2217_v9 }
 0x40a   :  { %2220 = vrcp.f32 %v948_v10 }
 0x415   :  { %v2219_v12 = vpop.eup %2218 }
 0x416   :  { %v952_v15 = vmul.f32 %v2219_v12, %v951_v11  ;;  %v1738_v12 = vld [vmem:[%s2467_s23 + $0x70] sm:$0xff] }
 0x417   :  { %v2221_v18 = vpop.eup %2220 }
 0x418   :  { %v953_v16 = vadd.f32 %v1732_v13, %v952_v15  ;;  %v955_v19 = vsub.f32 1.0, %v2221_v18  ;;  %v957_v24 = vmul.f32 %v2221_v18, %v2932_v63 }
 0x41a   :  { %2222 = vtanh.f32 %v953_v16 }
 0x427   :  { %v2223_v21 = vpop.eup %2222 }
 0x428   :  { %v956_v22 = vmul.f32 %v2223_v21, %v955_v19 }
 0x42a   :  { %v958_v27 = vadd.f32 %v957_v24, %v956_v22  ;;  %v1141_v24 = vpop.permute.xlu0 %1140 }
 0x42b   :  { %vm1142_vm13 = vcmp.eq.s32.totalorder %v1141_v24, 1 }
 0x42c   :  { %v3011_v28 = vsel %vm966_vm12, %v958_v27, %v2932_v63  ;;  %v3095_v63 = vld [vmem:[#allocation2 + $0x138] sm:$0xff] }
 0x42d   :  { %1037 = vmatmul.mubr.f32.vlgmr.msra.gmra.mxu0 %v3011_v28  ;;  %2070 = vmatmul.mubr.f32.vlgmr.msra.gmra.mxu1 %v3011_v28 }
 0x42e   :  { %1149 = vmatpush1.msra.mxu0 %v3015_v30  ;;  %2073 = vmatpush3.msra.mxu1 %v3018_v51 }
 0x42f   :  { %1150 = vmatprep.subr.mxu0 %v3021_v31  ;;  %2074 = vmatprep.subr.mxu1 %v3373_v49 }
 0x430   :  { %1151 = vmatpush1.msra.mxu0 %v3025_v40  ;;  %2075 = vmatpush3.msra.mxu1 %v3028_v57 }
 0x431   :  { %1152 = vmatprep.subr.mxu0 %v3031_v55  ;;  %2076 = vmatprep.subr.mxu1 %v3373_v49 }
 0x432   :  { %1153 = vmatpush1.msra.mxu0 %v3035_v42  ;;  %2077 = vmatpush3.msra.mxu1 %v3038_v33 }
 0x433   :  { %1154 = vmatprep.subr.mxu0 %v3041_v36  ;;  %2078 = vmatprep.subr.mxu1 %v3373_v49 }
 0x434   :  { %1155 = vmatpush1.msra.mxu0 %v3045_v58  ;;  %2079 = vmatpush3.msra.mxu1 %v3048_v46 }
 0x435   :  { %1156 = vmatprep.subr.mxu0 %v3051_v39  ;;  %2080 = vmatprep.subr.mxu1 %v3373_v49 }
 0x436   :  { %1157 = vmatpush1.msra.mxu0 %v3055_v34  ;;  %2081 = vmatpush3.msra.mxu1 %v2596_v14  ;;  %v3075_v14 = vld [vmem:[#allocation2 + $0xf8] sm:$0xff] }
 0x437   :  { %1158 = vmatprep.subr.mxu0 %v3059_v41  ;;  %2082 = vmatprep.subr.mxu1 %v3373_v49 }
 0x438   :  { %1159 = vmatpush1.msra.mxu0 %v3063_v43  ;;  %2083 = vmatpush3.msra.mxu1 %v2606_v17  ;;  %v3083_v17 = vld [vmem:[#allocation2 + $0xb8] sm:$0xff] }
 0x439   :  { %1160 = vmatprep.subr.mxu0 %v3067_v44  ;;  %2084 = vmatprep.subr.mxu1 %v3373_v49 }
 0x43a   :  { %1161 = vmatpush1.msra.mxu0 %v3071_v45  ;;  %2085 = vmatpush3.msra.mxu1 %v2616_v20  ;;  %v3091_v20 = vld [vmem:[#allocation2 + $0x120] sm:$0xff] }
 0x43b   :  { %1162 = vmatprep.subr.mxu0 %v3075_v14  ;;  %2086 = vmatprep.subr.mxu1 %v3373_v49 }
 0x43c   :  { %1163 = vmatpush1.msra.mxu0 %v3079_v47  ;;  %2087 = vmatpush3.msra.mxu1 %v2626_v23  ;;  %v3099_v23 = vld [vmem:[#allocation2 + $0x80] sm:$0xff] }
 0x43d   :  { %1164 = vmatprep.subr.mxu0 %v3083_v17  ;;  %2088 = vmatprep.subr.mxu1 %v3373_v49 }
 0x43e   :  { %1165 = vmatpush1.msra.mxu0 %v3087_v48  ;;  %2089 = vmatpush3.msra.mxu1 %v2636_v26  ;;  %v3107_v26 = vld [vmem:[#allocation2 + $0x100] sm:$0xff] }
 0x43f   :  { %1166 = vmatprep.subr.mxu0 %v3091_v20  ;;  %2090 = vmatprep.subr.mxu1 %v3373_v49 }
 0x440   :  { %1167 = vmatpush1.msra.mxu0 %v3095_v63  ;;  %2091 = vmatpush3.msra.mxu1 %v2646_v29  ;;  %v3115_v29 = vld [vmem:[#allocation2 + $0x90] sm:$0xff] }
 0x441   :  { %1168 = vmatprep.subr.mxu0 %v3099_v23  ;;  %2092 = vmatprep.subr.mxu1 %v3373_v49 }
 0x442   :  { %1169 = vmatpush1.msra.mxu0 %v3103_v60  ;;  %2093 = vmatpush3.msra.mxu1 %v2656_v32  ;;  %v3123_v32 = vld [vmem:[#allocation2 + $0x178] sm:$0xff] }
 0x443   :  { %1170 = vmatprep.subr.mxu0 %v3107_v26  ;;  %2094 = vmatprep.subr.mxu1 %v3373_v49 }
 0x444   :  { %1171 = vmatpush1.msra.mxu0 %v3111_v61  ;;  %2095 = vmatpush3.msra.mxu1 %v2667_v35  ;;  %v3131_v35 = vld [vmem:[#allocation2 + $0x160] sm:$0xff] }
 0x445   :  { %1172 = vmatprep.subr.mxu0 %v3115_v29  ;;  %2096 = vmatprep.subr.mxu1 %v3373_v49 }
 0x446   :  { %1173 = vmatpush1.msra.mxu0 %v3119_v62  ;;  %2097 = vmatpush3.msra.mxu1 %v2674_v37  ;;  %v3135_v37 = vld [vmem:[#allocation2 + $0x48] sm:$0xff] }
 0x447   :  { %1174 = vmatprep.subr.mxu0 %v3123_v32  ;;  %2098 = vmatprep.subr.mxu1 %v3373_v49 }
 0x448   :  { %1175 = vmatpush1.msra.mxu0 %v3127_v0  ;;  %2099 = vmatpush3.msra.mxu1 %v2680_v38  ;;  %v1736_v38 = vld [vmem:[%s2467_s23 + $0x60] sm:$0xff] }
 0x449   :  { %1176 = vmatprep.subr.mxu0 %v3131_v35  ;;  %2100 = vmatprep.subr.mxu1 %v3373_v49 }
 0x44a   :  { %1177 = vmatpush1.msra.mxu0 %v3135_v37  ;;  %2101 = vmatpush3.msra.mxu1 %v3384_v52 }
 0x44b   :  { %1178 = vmatprep.subr.mxu0 %v3385_v53  ;;  %2102 = vmatprep.subr.mxu1 %v3373_v49 }
 0x44c   :  { %1179 = vmatpush1.msra.mxu0 %v3386_v54  ;;  %1212 = vmatprep.mubr.f32.mxu0 %v3373_v49 }
 0x44d   :  { %2103 = vmatpush3.msra.mxu1 %v3387_v56  ;;  %2104 = vmatprep.mubr.msk.f32.mxu1 %vm2319_vm1, %v3373_v49 }
 0x44e   :  { %1324 = vmatprep.subr.mxu0 %v3001_v59  ;;  %2107 = vmatprep.subr.mxu1 %v3373_v49 }
 0x4ed   :  { %v1038_v1 = vpop.f32.mrf.mxu0  ;;  %v1109_v52 = vpop.f32.mrf.mxu1 }
 0x4ee   :  { %v1113_v2 = vadd.f32 %v1736_v38, %v1038_v1  ;;  %v1127_v10 = vadd.f32 %v2513_v50, %v1109_v52  ;;  %v3181_v38 = vld [vmem:[#allocation2 + $0x60] sm:$0xff]  ;;  %v3187_v1 = vld [vmem:[#allocation2 + $0x170] sm:$0xff] }
 0x4ef   :  { %v2071_v53 = vpop.f32.mrf.mxu1  ;;  %v1040_v54 = vpop.f32.mrf.mxu0  ;;  %v3193_v52 = vld [vmem:[#allocation2 + $0x20] sm:$0xff] }
 0x4f0   :  { %v1739_v3 = vmul.f32 -1.442695, %v1113_v2  ;;  %v1120_v5 = vadd.f32 %v1737_v4, %v1040_v54  ;;  %v3199_v2 = vld [vmem:[#allocation2 + $0x168] sm:$0xff]  ;;  %v3205_v53 = vld [vmem:[#allocation2 + $0xe0] sm:$0xff]  ;;  %v3217_v4 = vld [vmem:[#allocation2 + $0x58] sm:$0xff] }
 0x4f1   :  { %v3223_v54 = vld [vmem:[#allocation2 + $0x118] sm:$0xff] }
 0x4f2   :  { %2224 = vpow2.f32 %v1739_v3  ;;  %v1740_v6 = vmul.f32 -1.442695, %v1120_v5  ;;  %v3211_v3 = vld [vmem:[#allocation2 + $0x130] sm:$0xff]  ;;  %v3229_v5 = vld [vmem:[#allocation2 + $0x108] sm:$0xff] }
 0x4f4   :  { %2226 = vpow2.f32 %v1740_v6  ;;  %v3235_v6 = vld [vmem:[#allocation2 + $0x128] sm:$0xff] }
 0x4f5   :  { %3388 = vst [vmem:[#allocation10_spill] sm:$0xff] %v3235_v6 }
 0x4ff   :  { %v2225_v56 = vpop.eup %2224 }
 0x500   :  { %v1117_v7 = vadd.f32 1.0, %v2225_v56  ;;  %v3238_v56 = vld [vmem:[#allocation2 + $0xd0] sm:$0xff] }
 0x501   :  { %v2227_v8 = vpop.eup %2226  ;;  %3389 = vst [vmem:[#allocation13_spill] sm:$0xff] %v3238_v56 }
 0x502   :  { %2228 = vrcp.f32 %v1117_v7  ;;  %v1124_v9 = vadd.f32 1.0, %v2227_v8  ;;  %v3242_v7 = vld [vmem:[#allocation2 + $0xb0] sm:$0xff] }
 0x503   :  { %3390 = vst [vmem:[#allocation11_spill] sm:$0xff] %v3242_v7  ;;  %v3246_v8 = vld [vmem:[#allocation2 + $0x10] sm:$0xff] }
 0x504   :  { %2230 = vrcp.f32 %v1124_v9  ;;  %3391 = vst [vmem:[#allocation12_spill] sm:$0xff] %v3246_v8  ;;  %v1742_v9 = vld [vmem:[%s2467_s23 + $0x78] sm:$0xff] }
 0x50f   :  { %v2229_v11 = vpop.eup %2228 }
 0x510   :  { %v1128_v13 = vmul.f32 %v2229_v11, %v1127_v10 }
 0x511   :  { %v2231_v16 = vpop.eup %2230 }
 0x512   :  { %v1129_v15 = vadd.f32 %v1738_v12, %v1128_v13  ;;  %v1131_v18 = vsub.f32 1.0, %v2231_v16  ;;  %v1133_v22 = vmul.f32 %v2231_v16, %v3011_v28  ;;  %v1743_v16 = vld [vmem:[%s2467_s23 + $0x80] sm:$0xff] }
 0x514   :  { %2232 = vtanh.f32 %v1129_v15 }
 0x521   :  { %v2233_v19 = vpop.eup %2232 }
 0x522   :  { %v1132_v21 = vmul.f32 %v2233_v19, %v1131_v18 }
 0x524   :  { %v1134_v25 = vadd.f32 %v1133_v22, %v1132_v21 }
 0x526   :  { %v3154_v27 = vsel %vm1142_vm13, %v1134_v25, %v3011_v28  ;;  %v3175_v28 = vld [vmem:[#allocation2 + $0x38] sm:$0xff] }
 0x527   :  { %1213 = vmatmul.mubr.f32.vlgmr.msra.gmra.mxu0 %v3154_v27  ;;  %2105 = vmatmul.mubr.f32.vlgmr.msra.gmra.mxu1 %v3154_v27 }
 0x528   :  { %1325 = vmatpush1.msra.mxu0 %v3015_v30  ;;  %2108 = vmatpush3.msra.mxu1 %v3018_v51 }
 0x529   :  { %1326 = vmatprep.subr.mxu0 %v3021_v31  ;;  %2109 = vmatprep.subr.mxu1 %v3373_v49 }
 0x52a   :  { %1327 = vmatpush1.msra.mxu0 %v3025_v40  ;;  %2110 = vmatpush3.msra.mxu1 %v3028_v57 }
 0x52b   :  { %1328 = vmatprep.subr.mxu0 %v3031_v55  ;;  %2111 = vmatprep.subr.mxu1 %v3373_v49 }
 0x52c   :  { %1329 = vmatpush1.msra.mxu0 %v3035_v42  ;;  %2112 = vmatpush3.msra.mxu1 %v3038_v33 }
 0x52d   :  { %1330 = vmatprep.subr.mxu0 %v3041_v36  ;;  %2113 = vmatprep.subr.mxu1 %v3373_v49 }
 0x52e   :  { %1331 = vmatpush1.msra.mxu0 %v3045_v58  ;;  %2114 = vmatpush3.msra.mxu1 %v3048_v46 }
 0x52f   :  { %1332 = vmatprep.subr.mxu0 %v3051_v39  ;;  %2115 = vmatprep.subr.mxu1 %v3373_v49 }
 0x530   :  { %1333 = vmatpush1.msra.mxu0 %v3055_v34  ;;  %2116 = vmatpush3.msra.mxu1 %v3175_v28 }
 0x531   :  { %1334 = vmatprep.subr.mxu0 %v3059_v41  ;;  %2117 = vmatprep.subr.mxu1 %v3373_v49 }
 0x532   :  { %1335 = vmatpush1.msra.mxu0 %v3063_v43  ;;  %2118 = vmatpush3.msra.mxu1 %v3181_v38 }
 0x533   :  { %1336 = vmatprep.subr.mxu0 %v3067_v44  ;;  %2119 = vmatprep.subr.mxu1 %v3373_v49 }
 0x534   :  { %1337 = vmatpush1.msra.mxu0 %v3071_v45  ;;  %2120 = vmatpush3.msra.mxu1 %v3187_v1 }
 0x535   :  { %1338 = vmatprep.subr.mxu0 %v3075_v14  ;;  %2121 = vmatprep.subr.mxu1 %v3373_v49 }
 0x536   :  { %1339 = vmatpush1.msra.mxu0 %v3079_v47  ;;  %2122 = vmatpush3.msra.mxu1 %v3193_v52 }
 0x537   :  { %1340 = vmatprep.subr.mxu0 %v3083_v17  ;;  %2123 = vmatprep.subr.mxu1 %v3373_v49 }
 0x538   :  { %1341 = vmatpush1.msra.mxu0 %v3087_v48  ;;  %2124 = vmatpush3.msra.mxu1 %v3199_v2 }
 0x539   :  { %1342 = vmatprep.subr.mxu0 %v3091_v20  ;;  %2125 = vmatprep.subr.mxu1 %v3373_v49 }
 0x53a   :  { %1343 = vmatpush1.msra.mxu0 %v3095_v63  ;;  %2126 = vmatpush3.msra.mxu1 %v3205_v53 }
 0x53b   :  { %1344 = vmatprep.subr.mxu0 %v3099_v23  ;;  %2127 = vmatprep.subr.mxu1 %v3373_v49 }
 0x53c   :  { %1345 = vmatpush1.msra.mxu0 %v3103_v60  ;;  %2128 = vmatpush3.msra.mxu1 %v3211_v3 }
 0x53d   :  { %1346 = vmatprep.subr.mxu0 %v3107_v26  ;;  %2129 = vmatprep.subr.mxu1 %v3373_v49 }
 0x53e   :  { %1347 = vmatpush1.msra.mxu0 %v3111_v61  ;;  %2130 = vmatpush3.msra.mxu1 %v3217_v4 }
 0x53f   :  { %1348 = vmatprep.subr.mxu0 %v3115_v29  ;;  %2131 = vmatprep.subr.mxu1 %v3373_v49 }
 0x540   :  { %1349 = vmatpush1.msra.mxu0 %v3119_v62  ;;  %2132 = vmatpush3.msra.mxu1 %v3223_v54 }
 0x541   :  { %1350 = vmatprep.subr.mxu0 %v3123_v32  ;;  %2133 = vmatprep.subr.mxu1 %v3373_v49 }
 0x542   :  { %1351 = vmatpush1.msra.mxu0 %v3127_v0  ;;  %2134 = vmatpush3.msra.mxu1 %v3229_v5 }
 0x543   :  { %1352 = vmatprep.subr.mxu0 %v3131_v35  ;;  %2135 = vmatprep.subr.mxu1 %v3373_v49 }
 0x544   :  { %1353 = vmatpush1.msra.mxu0 %v3135_v37  ;;  %2136 = vmatpush3.msra.mxu1 %v3235_v6 }
 0x545   :  { %1354 = vmatprep.subr.mxu0 %v3238_v56  ;;  %2137 = vmatprep.subr.mxu1 %v3373_v49  ;;  %v1744_v56 = vld [vmem:[%s2467_s23 + $0x88] sm:$0xff] }
 0x546   :  { %1355 = vmatpush1.msra.mxu0 %v3242_v7  ;;  %1388 = vmatprep.mubr.f32.mxu0 %v3373_v49 }
 0x547   :  { %2138 = vmatpush3.msra.mxu1 %v3246_v8  ;;  %2139 = vmatprep.mubr.msk.f32.mxu1 %vm2319_vm1, %v3373_v49 }
 0x548   :  { %1500 = vmatprep.subr.mxu0 %v3001_v59  ;;  %2142 = vmatprep.subr.mxu1 %v3373_v49 }
 0x5e7   :  { %v1214_v10 = vpop.f32.mrf.mxu0  ;;  %v1285_v11 = vpop.f32.mrf.mxu1 }
 0x5e8   :  { %v1289_v12 = vadd.f32 %v1742_v9, %v1214_v10  ;;  %v1303_v8 = vadd.f32 %v2513_v50, %v1285_v11 }
 0x5e9   :  { %v2106_v13 = vpop.f32.mrf.mxu1  ;;  %v1216_v18 = vpop.f32.mrf.mxu0 }
 0x5ea   :  { %v1745_v15 = vmul.f32 -1.442695, %v1289_v12  ;;  %v1296_v19 = vadd.f32 %v1743_v16, %v1216_v18  ;;  %v1317_v18 = vpop.permute.xlu1 %1316 }
 0x5eb   :  { %vm1318_vm14 = vcmp.eq.s32.totalorder %v1317_v18, 1 }
 0x5ec   :  { %2234 = vpow2.f32 %v1745_v15  ;;  %v1746_v21 = vmul.f32 -1.442695, %v1296_v19 }
 0x5ee   :  { %2236 = vpow2.f32 %v1746_v21 }
 0x5f9   :  { %v2235_v22 = vpop.eup %2234 }
 0x5fa   :  { %v1293_v24 = vadd.f32 1.0, %v2235_v22 }
 0x5fb   :  { %v2237_v25 = vpop.eup %2236 }
 0x5fc   :  { %2238 = vrcp.f32 %v1293_v24  ;;  %v1300_v59 = vadd.f32 1.0, %v2237_v25 }
 0x5fe   :  { %2240 = vrcp.f32 %v1300_v59  ;;  %v1669_v59 = vpop.permute.xlu1 %1668 }
 0x5ff   :  { %vm1670_vm0 = vcmp.eq.s32.totalorder %v1669_v59, 1 }
 0x609   :  { %v2239_v7 = vpop.eup %2238 }
 0x60a   :  { %v1304_v6 = vmul.f32 %v2239_v7, %v1303_v8  ;;  %v1756_v7 = vld [vmem:[%s2467_s23 + $0xb8] sm:$0xff] }
 0x60b   :  { %v2241_v10 = vpop.eup %2240 }
 0x60c   :  { %v1305_v9 = vadd.f32 %v1744_v56, %v1304_v6  ;;  %v1307_v12 = vsub.f32 1.0, %v2241_v10  ;;  %v1309_v16 = vmul.f32 %v2241_v10, %v3154_v27 }
 0x60e   :  { %2242 = vtanh.f32 %v1305_v9 }
 0x61b   :  { %v2243_v13 = vpop.eup %2242 }
 0x61c   :  { %v1308_v15 = vmul.f32 %v2243_v13, %v1307_v12 }
 0x61e   :  { %v1310_v19 = vadd.f32 %v1309_v16, %v1308_v15 }
 0x620   :  { %v3259_v21 = vsel %vm1318_vm14, %v1310_v19, %v3154_v27 }
 0x621   :  { %1389 = vmatmul.mubr.f32.vlgmr.msra.gmra.mxu0 %v3259_v21  ;;  %2140 = vmatmul.mubr.f32.vlgmr.msra.gmra.mxu1 %v3259_v21 }
 0x622   :  { %1501 = vmatpush1.msra.mxu0 %v3015_v30  ;;  %2143 = vmatpush3.msra.mxu1 %v3018_v51  ;;  %v3392_v30 = vld [vmem:[#allocation10_spill] sm:$0xff]  ;;  %v3393_v51 = vld [vmem:[#allocation13_spill] sm:$0xff] }
 0x623   :  { %1502 = vmatprep.subr.mxu0 %v3021_v31  ;;  %2144 = vmatprep.subr.mxu1 %v3373_v49  ;;  %v3394_v31 = vld [vmem:[#allocation11_spill] sm:$0xff] }
 0x624   :  { %1503 = vmatpush1.msra.mxu0 %v3025_v40  ;;  %2145 = vmatpush3.msra.mxu1 %v3028_v57  ;;  %v3395_v40 = vld [vmem:[#allocation12_spill] sm:$0xff]  ;;  %v1748_v57 = vld [vmem:[%s2467_s23 + $0x90] sm:$0xff] }
 0x625   :  { %1504 = vmatprep.subr.mxu0 %v3031_v55  ;;  %2146 = vmatprep.subr.mxu1 %v3373_v49 }
 0x626   :  { %1505 = vmatpush1.msra.mxu0 %v3035_v42  ;;  %2147 = vmatpush3.msra.mxu1 %v3038_v33 }
 0x627   :  { %1506 = vmatprep.subr.mxu0 %v3041_v36  ;;  %2148 = vmatprep.subr.mxu1 %v3373_v49 }
 0x628   :  { %1507 = vmatpush1.msra.mxu0 %v3045_v58  ;;  %2149 = vmatpush3.msra.mxu1 %v3048_v46  ;;  %v1749_v46 = vld [vmem:[%s2467_s23 + $0x98] sm:$0xff] }
 0x629   :  { %1508 = vmatprep.subr.mxu0 %v3051_v39  ;;  %2150 = vmatprep.subr.mxu1 %v3373_v49 }
 0x62a   :  { %1509 = vmatpush1.msra.mxu0 %v3055_v34  ;;  %2151 = vmatpush3.msra.mxu1 %v3175_v28 }
 0x62b   :  { %1510 = vmatprep.subr.mxu0 %v3059_v41  ;;  %2152 = vmatprep.subr.mxu1 %v3373_v49 }
 0x62c   :  { %1511 = vmatpush1.msra.mxu0 %v3063_v43  ;;  %2153 = vmatpush3.msra.mxu1 %v3181_v38 }
 0x62d   :  { %1512 = vmatprep.subr.mxu0 %v3067_v44  ;;  %2154 = vmatprep.subr.mxu1 %v3373_v49 }
 0x62e   :  { %1513 = vmatpush1.msra.mxu0 %v3071_v45  ;;  %2155 = vmatpush3.msra.mxu1 %v3187_v1  ;;  %v1755_v1 = vld [vmem:[%s2467_s23 + $0xb0] sm:$0xff] }
 0x62f   :  { %1514 = vmatprep.subr.mxu0 %v3075_v14  ;;  %2156 = vmatprep.subr.mxu1 %v3373_v49 }
 0x630   :  { %1515 = vmatpush1.msra.mxu0 %v3079_v47  ;;  %2157 = vmatpush3.msra.mxu1 %v3193_v52 }
 0x631   :  { %1516 = vmatprep.subr.mxu0 %v3083_v17  ;;  %2158 = vmatprep.subr.mxu1 %v3373_v49  ;;  %v1750_v17 = vld [vmem:[%s2467_s23 + $0xa0] sm:$0xff] }
 0x632   :  { %1517 = vmatpush1.msra.mxu0 %v3087_v48  ;;  %2159 = vmatpush3.msra.mxu1 %v3199_v2 }
 0x633   :  { %1518 = vmatprep.subr.mxu0 %v3091_v20  ;;  %2160 = vmatprep.subr.mxu1 %v3373_v49 }
 0x634   :  { %1519 = vmatpush1.msra.mxu0 %v3095_v63  ;;  %2161 = vmatpush3.msra.mxu1 %v3205_v53 }
 0x635   :  { %1520 = vmatprep.subr.mxu0 %v3099_v23  ;;  %2162 = vmatprep.subr.mxu1 %v3373_v49 }
 0x636   :  { %1521 = vmatpush1.msra.mxu0 %v3103_v60  ;;  %2163 = vmatpush3.msra.mxu1 %v3211_v3 }
 0x637   :  { %1522 = vmatprep.subr.mxu0 %v3107_v26  ;;  %2164 = vmatprep.subr.mxu1 %v3373_v49  ;;  %v1493_v26 = vpop.permute.xlu0 %1492 }
 0x638   :  { %1523 = vmatpush1.msra.mxu0 %v3111_v61  ;;  %2165 = vmatpush3.msra.mxu1 %v3217_v4  ;;  %vm1494_vm15 = vcmp.eq.s32.totalorder %v1493_v26, 1 }
 0x639   :  { %1524 = vmatprep.subr.mxu0 %v3115_v29  ;;  %2166 = vmatprep.subr.mxu1 %v3373_v49 }
 0x63a   :  { %1525 = vmatpush1.msra.mxu0 %v3119_v62  ;;  %2167 = vmatpush3.msra.mxu1 %v3223_v54 }
 0x63b   :  { %1526 = vmatprep.subr.mxu0 %v3123_v32  ;;  %2168 = vmatprep.subr.mxu1 %v3373_v49 }
 0x63c   :  { %1527 = vmatpush1.msra.mxu0 %v3127_v0  ;;  %2169 = vmatpush3.msra.mxu1 %v3229_v5  ;;  %v1754_v0 = vld [vmem:[%s2467_s23 + $0xa8] sm:$0xff] }
 0x63d   :  { %1528 = vmatprep.subr.mxu0 %v3131_v35  ;;  %2170 = vmatprep.subr.mxu1 %v3373_v49 }
 0x63e   :  { %1529 = vmatpush1.msra.mxu0 %v3135_v37  ;;  %2171 = vmatpush3.msra.mxu1 %v3392_v30 }
 0x63f   :  { %1530 = vmatprep.subr.mxu0 %v3393_v51  ;;  %2172 = vmatprep.subr.mxu1 %v3373_v49 }
 0x640   :  { %1531 = vmatpush1.msra.mxu0 %v3394_v31  ;;  %1564 = vmatprep.mubr.f32.mxu0 %v3373_v49 }
 0x641   :  { %2173 = vmatpush3.msra.mxu1 %v3395_v40  ;;  %2174 = vmatprep.mubr.msk.f32.mxu1 %vm2319_vm1, %v3373_v49 }
 0x6e1   :  { %v1390_v55 = vpop.f32.mrf.mxu0  ;;  %v1461_v42 = vpop.f32.mrf.mxu1 }
 0x6e2   :  { %v1465_v33 = vadd.f32 %v1748_v57, %v1390_v55  ;;  %v1479_v49 = vadd.f32 %v2513_v50, %v1461_v42 }
 0x6e3   :  { %v2141_v36 = vpop.f32.mrf.mxu1  ;;  %v1392_v39 = vpop.f32.mrf.mxu0 }
 0x6e4   :  { %v1751_v58 = vmul.f32 -1.442695, %v1465_v33  ;;  %v1472_v34 = vadd.f32 %v1749_v46, %v1392_v39 }
 0x6e6   :  { %2244 = vpow2.f32 %v1751_v58  ;;  %v1752_v41 = vmul.f32 -1.442695, %v1472_v34 }
 0x6e8   :  { %2246 = vpow2.f32 %v1752_v41 }
 0x6f3   :  { %v2245_v43 = vpop.eup %2244 }
 0x6f4   :  { %v1469_v44 = vadd.f32 1.0, %v2245_v43 }
 0x6f5   :  { %v2247_v45 = vpop.eup %2246 }
 0x6f6   :  { %2248 = vrcp.f32 %v1469_v44  ;;  %v1476_v14 = vadd.f32 1.0, %v2247_v45 }
 0x6f8   :  { %2250 = vrcp.f32 %v1476_v14 }
 0x703   :  { %v2249_v47 = vpop.eup %2248 }
 0x704   :  { %v1480_v48 = vmul.f32 %v2249_v47, %v1479_v49 }
 0x705   :  { %v2251_v63 = vpop.eup %2250 }
 0x706   :  { %v1481_v20 = vadd.f32 %v1750_v17, %v1480_v48  ;;  %v1483_v23 = vsub.f32 1.0, %v2251_v63  ;;  %v1485_v29 = vmul.f32 %v2251_v63, %v3259_v21 }
 0x708   :  { %2252 = vtanh.f32 %v1481_v20 }
 0x715   :  { %v2253_v60 = vpop.eup %2252 }
 0x716   :  { %v1484_v61 = vmul.f32 %v2253_v60, %v1483_v23 }
 0x718   :  { %v1486_v62 = vadd.f32 %v1485_v29, %v1484_v61 }
 0x71a   :  { %v1495_v32 = vsel %vm1494_vm15, %v1486_v62, %v3259_v21 }
 0x71b   :  { %1565 = vmatmul.mubr.f32.vlgmr.msra.gmra.mxu0 %v1495_v32  ;;  %2175 = vmatmul.mubr.f32.vlgmr.msra.gmra.mxu1 %v1495_v32 }
 0x7db   :  { %v1566_v35 = vpop.f32.mrf.mxu0  ;;  %v1637_v37 = vpop.f32.mrf.mxu1 }
 0x7dc   :  { %v1641_v27 = vadd.f32 %v1754_v0, %v1566_v35  ;;  %v1655_v6 = vadd.f32 %v2513_v50, %v1637_v37 }
 0x7dd   :  { %v2176_v28 = vpop.f32.mrf.mxu1  ;;  %v1568_v52 = vpop.f32.mrf.mxu0 }
 0x7de   :  { %v1757_v38 = vmul.f32 -1.442695, %v1641_v27  ;;  %v1648_v2 = vadd.f32 %v1755_v1, %v1568_v52 }
 0x7e0   :  { %2254 = vpow2.f32 %v1757_v38  ;;  %v1758_v53 = vmul.f32 -1.442695, %v1648_v2 }
 0x7e2   :  { %2256 = vpow2.f32 %v1758_v53 }
 0x7ed   :  { %v2255_v3 = vpop.eup %2254 }
 0x7ee   :  { %v1645_v4 = vadd.f32 1.0, %v2255_v3 }
 0x7ef   :  { %v2257_v54 = vpop.eup %2256 }
 0x7f0   :  { %2258 = vrcp.f32 %v1645_v4  ;;  %v1652_v5 = vadd.f32 1.0, %v2257_v54 }
 0x7f2   :  { %2260 = vrcp.f32 %v1652_v5 }
 0x7fd   :  { %v2259_v56 = vpop.eup %2258 }
 0x7fe   :  { %v1656_v8 = vmul.f32 %v2259_v56, %v1655_v6 }
 0x7ff   :  { %v2261_v22 = vpop.eup %2260 }
 0x800   :  { %v1657_v11 = vadd.f32 %v1756_v7, %v1656_v8  ;;  %v1659_v24 = vsub.f32 1.0, %v2261_v22  ;;  %v1661_v10 = vmul.f32 %v2261_v22, %v1495_v32 }
 0x802   :  { %2262 = vtanh.f32 %v1657_v11 }
 0x80f   :  { %v2263_v25 = vpop.eup %2262 }
 0x810   :  { %v1660_v9 = vmul.f32 %v2263_v25, %v1659_v24 }
 0x812   :  { %v1662_v12 = vadd.f32 %v1661_v10, %v1660_v9 }
 0x814   :  { %v1671_v13 = vsel %vm1670_vm0, %v1662_v12, %v1495_v32 }
 0x815   :  { %1672 = vst [vmem:[#allocation3] sm:$0xff] %v1671_v13 }
 0x816 PF:  {}
 0x81c   :  { %v1676_v15 = vld [vmem:[#allocation3] sm:$0xff] }
 0x81d   :  { %v1677_v16 = vmul.f32 %v1676_v15, %v1676_v15 }
 0x81f   :  { %1678 = vadd.xlane.f32.xlu0 %v1677_v16 }
 0x8a8   :  { %v1679_v50 = vpop.xlane.xlu0 %1678 }
 0x8a9   :  { %v1680_v18 = vadd.f32 1e-12, %v1679_v50 }
 0x8ab   :  { %2312 = vrsqrt.f32 %v1680_v18 }
 0x8b8   :  { %v2313_v19 = vpop.eup %2312 }
 0x8b9   :  { %v1682_v21 = vmul.f32 %v2313_v19, %v1676_v15 }
 0x8bb   :  { %1683 = vst [vmem:[%s3345_s5] sm:$0xff] %v1682_v21 }
 0x8bc   :  { %1688 = vsyncmov [#allocation4] }
 0x8bf   :  { %s1689_s4 = vpop.sfrf %1688 }
 0x8c0   :  { %p1760_p3 = scmp.ne.s32.totalorder %s1689_s4, 0 }
 0x8c2   :  { %1693 = shalt.err (%p1760_p3)  }

</bundles_post_ra>
